<compile_context>
chip_gen: v7x
topology: tpu7x:2x2x1
jax: 0.10.0
libtpu: 0.0.40
codegen_flags: <defaults>
</compile_context>

<pallas_src>
import functools

import jax
import jax.numpy as jnp
from jax.experimental import pallas as pl
from jax.experimental.pallas import tpu as pltpu


def _rr_block_kernel(x_ref, w1_ref, b1_ref, wr_ref, scale_ref, shift_ref, o_ref,
                     *, H, W, Cout, t):
    # x_ref:     (1, Cin, H*W)      input image (one batch element, channels-first)
    # w1_ref:    (Cout, Cin)        1x1 conv weight
    # b1_ref:    (Cout, 1)          1x1 conv bias
    # wr_ref:    (2, Cout, 9*Cout)  3x3 conv weights, taps folded into K, per rec_block
    # scale_ref: (2, Cout, 1)       fused BatchNorm scale, per rec_block
    # shift_ref: (2, Cout, 1)       fused conv-bias + BatchNorm shift, per rec_block
    # o_ref:     (1, Cout, H*W)
    HW = H * W

    # 1x1 conv (pointwise) on the MXU: (Cout, Cin) @ (Cin, HW) -> (Cout, HW)
    img = jnp.dot(w1_ref[...], x_ref[0],
                  preferred_element_type=jnp.float32) + b1_ref[...]

    # Hoisted constants (zero-fill blocks + column-validity masks). JAX does not
    # CSE broadcasts, so build them exactly once for all 8 conv stages.
    zeros_by_width = {d: jnp.zeros((Cout, d), jnp.float32)
                      for d in sorted({1, W - 1, W, W + 1})}
    col = jax.lax.broadcasted_iota(jnp.int32, (Cout, HW), 1) % W
    col_mask = {-1: (col >= 1).astype(jnp.float32),      # source col w-1 must be >= 0
                0: None,
                1: (col <= W - 2).astype(jnp.float32)}   # source col w+1 must be <= W-1

    def tap(z, dh, dw):
        # out[:, h*W+w] = z[:, (h+dh)*W + (w+dw)] with zero "same"-conv padding.
        # Flat lane shift with zero fill handles the row boundaries; the column
        # mask kills the per-row wrap introduced by dw != 0.
        d = dh * W + dw
        if d > 0:
            s = jnp.concatenate([z[:, d:], zeros_by_width[d]], axis=-1)
        elif d < 0:
            s = jnp.concatenate([zeros_by_width[-d], z[:, :HW + d]], axis=-1)
        else:
            s = z
        m = col_mask[dw]
        return s if m is None else s * m

    feat = img
    for blk in range(2):                               # the two rec_blocks
        w_k = wr_ref[blk]                              # (Cout, 9*Cout)
        sc = jnp.broadcast_to(scale_ref[blk], (Cout, HW))   # hoisted broadcasts
        sh = jnp.broadcast_to(shift_ref[blk], (Cout, HW))

        def rec_conv(z):
            # im2col with the 9 taps stacked on the sublane axis -> one MXU matmul
            patch = jnp.concatenate(
                [tap(z, kh - 1, kw - 1) for kh in range(3) for kw in range(3)],
                axis=0)                                             # (9*Cout, HW)
            y = jnp.dot(w_k, patch, preferred_element_type=jnp.float32)
            return jnp.maximum(y * sc + sh, 0.0)                    # BN (eval) + ReLU, f32

        x1 = rec_conv(feat)                            # i == 0 branch
        for _ in range(t):                             # x1 = F(image + x1), t times
            x1 = rec_conv(feat + x1)
        feat = x1

    # TODO(synk): Dropout(0.5) is identity in eval mode; training-mode RNG dropout
    # (pltpu.prng_seed / prng_random_bits) and batch-statistics BN are not implemented.
    o_ref[0] = img + feat                              # rr_block residual add


def rr_block_forward(x_nchw, w1x1, b1x1, w3, b3, gamma, beta, run_mean, run_var,
                     t=3, eps=1e-5):
    """Eval-mode rr_block forward. w3/b3/gamma/beta/run_mean/run_var are length-2 lists."""
    N, Cin, H, W = x_nchw.shape
    Cout = w1x1.shape[0]
    HW = H * W

    # NCHW -> (N, C, H*W): channels on sublanes, pixels on lanes.  No transpose is
    # needed on either side of the kernel; the output write is lane-dense (256 lanes).
    x = x_nchw.reshape(N, Cin, HW).astype(jnp.float32)

    # 1x1 conv weight (Cout, Cin, 1, 1) -> (Cout, Cin); bias -> (Cout, 1)
    w1 = w1x1.reshape(Cout, Cin).astype(jnp.float32)
    b1 = b1x1.reshape(Cout, 1).astype(jnp.float32)

    # 3x3 conv weights: OIHW -> (O, kh, kw, I) -> (O, 9*I); tap-major matches the
    # in-kernel im2col patch ordering. Stacked per rec_block.
    wr = jnp.stack([jnp.transpose(w, (0, 2, 3, 1)).reshape(Cout, 9 * Cout)
                    for w in w3]).astype(jnp.float32)

    # Fuse conv bias + BatchNorm (eval-mode running statistics) into scale/shift
    scales = [g / jnp.sqrt(v + eps) for g, v in zip(gamma, run_var)]
    shifts = [be + (b - m) * s for be, b, m, s in zip(beta, b3, run_mean, scales)]
    scale = jnp.stack(scales).reshape(2, Cout, 1).astype(jnp.float32)
    shift = jnp.stack(shifts).reshape(2, Cout, 1).astype(jnp.float32)

    kernel = functools.partial(_rr_block_kernel, H=H, W=W, Cout=Cout, t=t)

    out = pl.pallas_call(
        kernel,
        out_shape=jax.ShapeDtypeStruct((N, Cout, HW), jnp.float32),
        grid_spec=pltpu.PrefetchScalarGridSpec(
            num_scalar_prefetch=0,
            grid=(N,),
            in_specs=[
                pl.BlockSpec((1, Cin, HW), lambda n: (n, 0, 0)),
                pl.BlockSpec((Cout, Cin), lambda n: (0, 0)),
                pl.BlockSpec((Cout, 1), lambda n: (0, 0)),
                pl.BlockSpec((2, Cout, 9 * Cout), lambda n: (0, 0, 0)),
                pl.BlockSpec((2, Cout, 1), lambda n: (0, 0, 0)),
                pl.BlockSpec((2, Cout, 1), lambda n: (0, 0, 0)),
            ],
            out_specs=pl.BlockSpec((1, Cout, HW), lambda n: (n, 0, 0)),
        ),
        compiler_params=pltpu.CompilerParams(dimension_semantics=("parallel",)),
    )(x, w1, b1, wr, scale, shift)

    # back to PyTorch NCHW convention (pure reshape, no transpose)
    return out.reshape(N, Cout, H, W)


def _reference_forward(x_nchw, w1x1, b1x1, w3, b3, gamma, beta, run_mean, run_var,
                       t=3, eps=1e-5):
    def rec_conv(z, blk):
        y = jax.lax.conv_general_dilated(
            z, w3[blk], (1, 1), ((1, 1), (1, 1)),
            dimension_numbers=("NCHW", "OIHW", "NCHW"))
        y = y + b3[blk][None, :, None, None]
        s = gamma[blk] / jnp.sqrt(run_var[blk] + eps)
        y = (y - run_mean[blk][None, :, None, None]) * s[None, :, None, None] \
            + beta[blk][None, :, None, None]
        return jnp.maximum(y, 0.0)

    img = jax.lax.conv_general_dilated(
        x_nchw, w1x1, (1, 1), ((0, 0), (0, 0)),
        dimension_numbers=("NCHW", "OIHW", "NCHW")) + b1x1[None, :, None, None]

    feat = img
    for blk in range(2):
        x1 = rec_conv(feat, blk)
        for _ in range(t):
            x1 = rec_conv(feat + x1, blk)
        feat = x1
    return img + feat


if __name__ == "__main__":
    key = jax.random.PRNGKey(0)
    keys = jax.random.split(key, 15)

    N, Cin, Cout, H, W, t = 2, 4, 8, 16, 16, 3

    x = jax.random.normal(keys[0], (N, Cin, H, W), dtype=jnp.float32)
    w1 = jax.random.normal(keys[1], (Cout, Cin, 1, 1), dtype=jnp.float32) * 0.3
    b1 = jax.random.normal(keys[2], (Cout,), dtype=jnp.float32) * 0.1

    w3, b3, gamma, beta, run_mean, run_var = [], [], [], [], [], []
    for blk in range(2):
        o = 3 + 6 * blk
        w3.append(jax.random.normal(keys[o], (Cout, Cout, 3, 3), dtype=jnp.float32) * 0.1)
        b3.append(jax.random.normal(keys[o + 1], (Cout,), dtype=jnp.float32) * 0.1)
        gamma.append(1.0 + 0.1 * jax.random.normal(keys[o + 2], (Cout,), dtype=jnp.float32))
        beta.append(0.1 * jax.random.normal(keys[o + 3], (Cout,), dtype=jnp.float32))
        run_mean.append(0.1 * jax.random.normal(keys[o + 4], (Cout,), dtype=jnp.float32))
        run_var.append(jnp.abs(1.0 + 0.1 * jax.random.normal(keys[o + 5], (Cout,),
                                                             dtype=jnp.float32)))

    out = rr_block_forward(x, w1, b1, w3, b3, gamma, beta, run_mean, run_var, t=t)
    out = jax.block_until_ready(out)

    ref = _reference_forward(x, w1, b1, w3, b3, gamma, beta, run_mean, run_var, t=t)
    assert out.shape == (N, Cout, H, W), out.shape
    max_err = float(jnp.max(jnp.abs(out - ref)))
    assert jnp.allclose(out, ref, atol=2e-3, rtol=2e-3), max_err

    print("KERNEL_OK")
</pallas_src>

<mosaic_0001>
module attributes {stable_mosaic.version = 11 : i64} {
  func.func @_rr_block_kernel(%arg0: i32, %arg1: memref<1x4x256xf32, #tpu.memory_space<vmem>>, %arg2: memref<8x4xf32, #tpu.memory_space<vmem>>, %arg3: memref<8x1xf32, #tpu.memory_space<vmem>>, %arg4: memref<2x8x72xf32, #tpu.memory_space<vmem>>, %arg5: memref<2x8x1xf32, #tpu.memory_space<vmem>>, %arg6: memref<2x8x1xf32, #tpu.memory_space<vmem>>, %arg7: memref<1x8x256xf32, #tpu.memory_space<vmem>>) attributes {dimension_semantics = [#tpu.dimension_semantics<parallel>], iteration_bounds = array<i64: 2>, scalar_prefetch = 0 : i64, scratch_operands = 0 : i64, tpu.core_type = #tpu.core_type<tc>, window_params = [{transform_indices = @transform_0, window_bounds = array<i64: 1, 4, 256>}, {pipeline_mode = #tpu.pipeline_mode<synchronous>, transform_indices = @transform_1, window_bounds = array<i64: 8, 4>}, {pipeline_mode = #tpu.pipeline_mode<synchronous>, transform_indices = @transform_2, window_bounds = array<i64: 8, 1>}, {pipeline_mode = #tpu.pipeline_mode<synchronous>, transform_indices = @transform_3, window_bounds = array<i64: 2, 8, 72>}, {pipeline_mode = #tpu.pipeline_mode<synchronous>, transform_indices = @transform_4, window_bounds = array<i64: 2, 8, 1>}, {pipeline_mode = #tpu.pipeline_mode<synchronous>, transform_indices = @transform_5, window_bounds = array<i64: 2, 8, 1>}, {transform_indices = @transform_6, window_bounds = array<i64: 1, 8, 256>}]} {
    %c0 = arith.constant 0 : index
    %c0_0 = arith.constant 0 : index
    %0 = vector.load %arg2[%c0, %c0_0] : memref<8x4xf32, #tpu.memory_space<vmem>>, vector<8x4xf32>
    %c0_1 = arith.constant 0 : index
    %c0_2 = arith.constant 0 : index
    %c0_3 = arith.constant 0 : index
    %1 = vector.load %arg1[%c0_1, %c0_2, %c0_3] : memref<1x4x256xf32, #tpu.memory_space<vmem>>, vector<1x4x256xf32>
    %2 = vector.shape_cast %1 : vector<1x4x256xf32> to vector<4x256xf32>
    %cst = arith.constant dense<0.000000e+00> : vector<8x256xf32>
    %3 = tpu.matmul %0, %2, %cst {dimension_numbers = #tpu.dot_dimension_numbers<[1], [0], [0], [1], [0, 0, 1, 1], [], []>} : vector<8x4xf32>, vector<4x256xf32>, vector<8x256xf32> -> vector<8x256xf32>
    %c0_4 = arith.constant 0 : index
    %c0_5 = arith.constant 0 : index
    %4 = vector.load %arg3[%c0_4, %c0_5] : memref<8x1xf32, #tpu.memory_space<vmem>>, vector<8x1xf32>
    %5 = vector.broadcast %4 : vector<8x1xf32> to vector<8x256xf32>
    %6 = arith.addf %3, %5 : vector<8x256xf32>
    %cst_6 = arith.constant 0.000000e+00 : f32
    %7 = vector.broadcast %cst_6 : f32 to vector<8x1xf32>
    %cst_7 = arith.constant 0.000000e+00 : f32
    %8 = vector.broadcast %cst_7 : f32 to vector<8x15xf32>
    %cst_8 = arith.constant 0.000000e+00 : f32
    %9 = vector.broadcast %cst_8 : f32 to vector<8x16xf32>
    %cst_9 = arith.constant 0.000000e+00 : f32
    %10 = vector.broadcast %cst_9 : f32 to vector<8x17xf32>
    %11 = tpu.iota {dimensions = array<i32: 1>} : vector<8x256xi32>
    %c16_i32 = arith.constant 16 : i32
    %c0_i32 = arith.constant 0 : i32
    %12 = arith.cmpi eq, %c16_i32, %c0_i32 : i32
    %c1_i32 = arith.constant 1 : i32
    %13 = arith.select %12, %c1_i32, %c16_i32 : i32
    %14 = vector.broadcast %13 : i32 to vector<8x256xi32>
    %15 = arith.remsi %11, %14 : vector<8x256xi32>
    %c0_i32_10 = arith.constant 0 : i32
    %16 = vector.broadcast %c0_i32_10 : i32 to vector<8x256xi32>
    %17 = arith.cmpi ne, %15, %16 : vector<8x256xi32>
    %c0_i32_11 = arith.constant 0 : i32
    %18 = vector.broadcast %c0_i32_11 : i32 to vector<8x256xi32>
    %19 = arith.cmpi slt, %15, %18 : vector<8x256xi32>
    %c0_i32_12 = arith.constant 0 : i32
    %20 = arith.cmpi slt, %13, %c0_i32_12 : i32
    %21 = vector.broadcast %20 : i1 to vector<8x256xi1>
    %22 = vector.broadcast %21 : vector<8x256xi1> to vector<8x256xi1>
    %23 = arith.xori %19, %22 : vector<8x256xi1>
    %24 = arith.andi %23, %17 : vector<8x256xi1>
    %25 = vector.broadcast %13 : i32 to vector<8x256xi32>
    %26 = arith.addi %15, %25 : vector<8x256xi32>
    %27 = arith.select %24, %26, %15 : vector<8x256xi1>, vector<8x256xi32>
    %c1_i32_13 = arith.constant 1 : i32
    %28 = vector.broadcast %c1_i32_13 : i32 to vector<8x256xi32>
    %29 = arith.cmpi sge, %27, %28 : vector<8x256xi32>
    %30 = arith.extui %29 : vector<8x256xi1> to vector<8x256xi32>
    %31 = arith.sitofp %30 : vector<8x256xi32> to vector<8x256xf32>
    %c14_i32 = arith.constant 14 : i32
    %32 = vector.broadcast %c14_i32 : i32 to vector<8x256xi32>
    %33 = arith.cmpi sle, %27, %32 : vector<8x256xi32>
    %34 = arith.extui %33 : vector<8x256xi1> to vector<8x256xi32>
    %35 = arith.sitofp %34 : vector<8x256xi32> to vector<8x256xf32>
    %c0_14 = arith.constant 0 : index
    %c0_15 = arith.constant 0 : index
    %c0_16 = arith.constant 0 : index
    %36 = vector.load %arg4[%c0_14, %c0_15, %c0_16] : memref<2x8x72xf32, #tpu.memory_space<vmem>>, vector<1x8x72xf32>
    %37 = vector.shape_cast %36 : vector<1x8x72xf32> to vector<8x72xf32>
    %c0_17 = arith.constant 0 : index
    %c0_18 = arith.constant 0 : index
    %c0_19 = arith.constant 0 : index
    %38 = vector.load %arg5[%c0_17, %c0_18, %c0_19] : memref<2x8x1xf32, #tpu.memory_space<vmem>>, vector<1x8x1xf32>
    %39 = vector.shape_cast %38 : vector<1x8x1xf32> to vector<8x1xf32>
    %40 = vector.shape_cast %39 : vector<8x1xf32> to vector<8x1xf32>
    %41 = vector.broadcast %40 : vector<8x1xf32> to vector<8x256xf32>
    %c0_20 = arith.constant 0 : index
    %c0_21 = arith.constant 0 : index
    %c0_22 = arith.constant 0 : index
    %42 = vector.load %arg6[%c0_20, %c0_21, %c0_22] : memref<2x8x1xf32, #tpu.memory_space<vmem>>, vector<1x8x1xf32>
    %43 = vector.shape_cast %42 : vector<1x8x1xf32> to vector<8x1xf32>
    %44 = vector.shape_cast %43 : vector<8x1xf32> to vector<8x1xf32>
    %45 = vector.broadcast %44 : vector<8x1xf32> to vector<8x256xf32>
    %46 = vector.extract_strided_slice %6 {offsets = [0, 0], sizes = [8, 239], strides = [1, 1]} : vector<8x256xf32> to vector<8x239xf32>
    %47 = tpu.concatenate %10, %46 in 1 : vector<8x17xf32>, vector<8x239xf32> -> vector<8x256xf32>
    %48 = arith.mulf %47, %31 : vector<8x256xf32>
    %49 = vector.extract_strided_slice %6 {offsets = [0, 0], sizes = [8, 240], strides = [1, 1]} : vector<8x256xf32> to vector<8x240xf32>
    %50 = tpu.concatenate %9, %49 in 1 : vector<8x16xf32>, vector<8x240xf32> -> vector<8x256xf32>
    %51 = vector.extract_strided_slice %6 {offsets = [0, 0], sizes = [8, 241], strides = [1, 1]} : vector<8x256xf32> to vector<8x241xf32>
    %52 = tpu.concatenate %8, %51 in 1 : vector<8x15xf32>, vector<8x241xf32> -> vector<8x256xf32>
    %53 = arith.mulf %52, %35 : vector<8x256xf32>
    %54 = vector.extract_strided_slice %6 {offsets = [0, 0], sizes = [8, 255], strides = [1, 1]} : vector<8x256xf32> to vector<8x255xf32>
    %55 = tpu.concatenate %7, %54 in 1 : vector<8x1xf32>, vector<8x255xf32> -> vector<8x256xf32>
    %56 = arith.mulf %55, %31 : vector<8x256xf32>
    %57 = vector.extract_strided_slice %6 {offsets = [0, 1], sizes = [8, 255], strides = [1, 1]} : vector<8x256xf32> to vector<8x255xf32>
    %58 = tpu.concatenate %57, %7 in 1 : vector<8x255xf32>, vector<8x1xf32> -> vector<8x256xf32>
    %59 = arith.mulf %58, %35 : vector<8x256xf32>
    %60 = vector.extract_strided_slice %6 {offsets = [0, 15], sizes = [8, 241], strides = [1, 1]} : vector<8x256xf32> to vector<8x241xf32>
    %61 = tpu.concatenate %60, %8 in 1 : vector<8x241xf32>, vector<8x15xf32> -> vector<8x256xf32>
    %62 = arith.mulf %61, %31 : vector<8x256xf32>
    %63 = vector.extract_strided_slice %6 {offsets = [0, 16], sizes = [8, 240], strides = [1, 1]} : vector<8x256xf32> to vector<8x240xf32>
    %64 = tpu.concatenate %63, %9 in 1 : vector<8x240xf32>, vector<8x16xf32> -> vector<8x256xf32>
    %65 = vector.extract_strided_slice %6 {offsets = [0, 17], sizes = [8, 239], strides = [1, 1]} : vector<8x256xf32> to vector<8x239xf32>
    %66 = tpu.concatenate %65, %10 in 1 : vector<8x239xf32>, vector<8x17xf32> -> vector<8x256xf32>
    %67 = arith.mulf %66, %35 : vector<8x256xf32>
    %68 = tpu.concatenate %48, %50, %53, %56, %6, %59, %62, %64, %67 in 0 : vector<8x256xf32>, vector<8x256xf32>, vector<8x256xf32>, vector<8x256xf32>, vector<8x256xf32>, vector<8x256xf32>, vector<8x256xf32>, vector<8x256xf32>, vector<8x256xf32> -> vector<72x256xf32>
    %cst_23 = arith.constant dense<0.000000e+00> : vector<8x256xf32>
    %69 = tpu.matmul %37, %68, %cst_23 {dimension_numbers = #tpu.dot_dimension_numbers<[1], [0], [0], [1], [0, 0, 1, 1], [], []>} : vector<8x72xf32>, vector<72x256xf32>, vector<8x256xf32> -> vector<8x256xf32>
    %70 = arith.mulf %69, %41 : vector<8x256xf32>
    %71 = arith.addf %70, %45 : vector<8x256xf32>
    %cst_24 = arith.constant 0.000000e+00 : f32
    %72 = vector.broadcast %cst_24 : f32 to vector<8x256xf32>
    %73 = arith.maximumf %71, %72 : vector<8x256xf32>
    %74 = arith.addf %6, %73 : vector<8x256xf32>
    %75 = vector.extract_strided_slice %74 {offsets = [0, 0], sizes = [8, 239], strides = [1, 1]} : vector<8x256xf32> to vector<8x239xf32>
    %76 = tpu.concatenate %10, %75 in 1 : vector<8x17xf32>, vector<8x239xf32> -> vector<8x256xf32>
    %77 = arith.mulf %76, %31 : vector<8x256xf32>
    %78 = vector.extract_strided_slice %74 {offsets = [0, 0], sizes = [8, 240], strides = [1, 1]} : vector<8x256xf32> to vector<8x240xf32>
    %79 = tpu.concatenate %9, %78 in 1 : vector<8x16xf32>, vector<8x240xf32> -> vector<8x256xf32>
    %80 = vector.extract_strided_slice %74 {offsets = [0, 0], sizes = [8, 241], strides = [1, 1]} : vector<8x256xf32> to vector<8x241xf32>
    %81 = tpu.concatenate %8, %80 in 1 : vector<8x15xf32>, vector<8x241xf32> -> vector<8x256xf32>
    %82 = arith.mulf %81, %35 : vector<8x256xf32>
    %83 = vector.extract_strided_slice %74 {offsets = [0, 0], sizes = [8, 255], strides = [1, 1]} : vector<8x256xf32> to vector<8x255xf32>
    %84 = tpu.concatenate %7, %83 in 1 : vector<8x1xf32>, vector<8x255xf32> -> vector<8x256xf32>
    %85 = arith.mulf %84, %31 : vector<8x256xf32>
    %86 = vector.extract_strided_slice %74 {offsets = [0, 1], sizes = [8, 255], strides = [1, 1]} : vector<8x256xf32> to vector<8x255xf32>
    %87 = tpu.concatenate %86, %7 in 1 : vector<8x255xf32>, vector<8x1xf32> -> vector<8x256xf32>
    %88 = arith.mulf %87, %35 : vector<8x256xf32>
    %89 = vector.extract_strided_slice %74 {offsets = [0, 15], sizes = [8, 241], strides = [1, 1]} : vector<8x256xf32> to vector<8x241xf32>
    %90 = tpu.concatenate %89, %8 in 1 : vector<8x241xf32>, vector<8x15xf32> -> vector<8x256xf32>
    %91 = arith.mulf %90, %31 : vector<8x256xf32>
    %92 = vector.extract_strided_slice %74 {offsets = [0, 16], sizes = [8, 240], strides = [1, 1]} : vector<8x256xf32> to vector<8x240xf32>
    %93 = tpu.concatenate %92, %9 in 1 : vector<8x240xf32>, vector<8x16xf32> -> vector<8x256xf32>
    %94 = vector.extract_strided_slice %74 {offsets = [0, 17], sizes = [8, 239], strides = [1, 1]} : vector<8x256xf32> to vector<8x239xf32>
    %95 = tpu.concatenate %94, %10 in 1 : vector<8x239xf32>, vector<8x17xf32> -> vector<8x256xf32>
    %96 = arith.mulf %95, %35 : vector<8x256xf32>
    %97 = tpu.concatenate %77, %79, %82, %85, %74, %88, %91, %93, %96 in 0 : vector<8x256xf32>, vector<8x256xf32>, vector<8x256xf32>, vector<8x256xf32>, vector<8x256xf32>, vector<8x256xf32>, vector<8x256xf32>, vector<8x256xf32>, vector<8x256xf32> -> vector<72x256xf32>
    %cst_25 = arith.constant dense<0.000000e+00> : vector<8x256xf32>
    %98 = tpu.matmul %37, %97, %cst_25 {dimension_numbers = #tpu.dot_dimension_numbers<[1], [0], [0], [1], [0, 0, 1, 1], [], []>} : vector<8x72xf32>, vector<72x256xf32>, vector<8x256xf32> -> vector<8x256xf32>
    %99 = arith.mulf %98, %41 : vector<8x256xf32>
    %100 = arith.addf %99, %45 : vector<8x256xf32>
    %cst_26 = arith.constant 0.000000e+00 : f32
    %101 = vector.broadcast %cst_26 : f32 to vector<8x256xf32>
    %102 = arith.maximumf %100, %101 : vector<8x256xf32>
    %103 = arith.addf %6, %102 : vector<8x256xf32>
    %104 = vector.extract_strided_slice %103 {offsets = [0, 0], sizes = [8, 239], strides = [1, 1]} : vector<8x256xf32> to vector<8x239xf32>
    %105 = tpu.concatenate %10, %104 in 1 : vector<8x17xf32>, vector<8x239xf32> -> vector<8x256xf32>
    %106 = arith.mulf %105, %31 : vector<8x256xf32>
    %107 = vector.extract_strided_slice %103 {offsets = [0, 0], sizes = [8, 240], strides = [1, 1]} : vector<8x256xf32> to vector<8x240xf32>
    %108 = tpu.concatenate %9, %107 in 1 : vector<8x16xf32>, vector<8x240xf32> -> vector<8x256xf32>
    %109 = vector.extract_strided_slice %103 {offsets = [0, 0], sizes = [8, 241], strides = [1, 1]} : vector<8x256xf32> to vector<8x241xf32>
    %110 = tpu.concatenate %8, %109 in 1 : vector<8x15xf32>, vector<8x241xf32> -> vector<8x256xf32>
    %111 = arith.mulf %110, %35 : vector<8x256xf32>
    %112 = vector.extract_strided_slice %103 {offsets = [0, 0], sizes = [8, 255], strides = [1, 1]} : vector<8x256xf32> to vector<8x255xf32>
    %113 = tpu.concatenate %7, %112 in 1 : vector<8x1xf32>, vector<8x255xf32> -> vector<8x256xf32>
    %114 = arith.mulf %113, %31 : vector<8x256xf32>
    %115 = vector.extract_strided_slice %103 {offsets = [0, 1], sizes = [8, 255], strides = [1, 1]} : vector<8x256xf32> to vector<8x255xf32>
    %116 = tpu.concatenate %115, %7 in 1 : vector<8x255xf32>, vector<8x1xf32> -> vector<8x256xf32>
    %117 = arith.mulf %116, %35 : vector<8x256xf32>
    %118 = vector.extract_strided_slice %103 {offsets = [0, 15], sizes = [8, 241], strides = [1, 1]} : vector<8x256xf32> to vector<8x241xf32>
    %119 = tpu.concatenate %118, %8 in 1 : vector<8x241xf32>, vector<8x15xf32> -> vector<8x256xf32>
    %120 = arith.mulf %119, %31 : vector<8x256xf32>
    %121 = vector.extract_strided_slice %103 {offsets = [0, 16], sizes = [8, 240], strides = [1, 1]} : vector<8x256xf32> to vector<8x240xf32>
    %122 = tpu.concatenate %121, %9 in 1 : vector<8x240xf32>, vector<8x16xf32> -> vector<8x256xf32>
    %123 = vector.extract_strided_slice %103 {offsets = [0, 17], sizes = [8, 239], strides = [1, 1]} : vector<8x256xf32> to vector<8x239xf32>
    %124 = tpu.concatenate %123, %10 in 1 : vector<8x239xf32>, vector<8x17xf32> -> vector<8x256xf32>
    %125 = arith.mulf %124, %35 : vector<8x256xf32>
    %126 = tpu.concatenate %106, %108, %111, %114, %103, %117, %120, %122, %125 in 0 : vector<8x256xf32>, vector<8x256xf32>, vector<8x256xf32>, vector<8x256xf32>, vector<8x256xf32>, vector<8x256xf32>, vector<8x256xf32>, vector<8x256xf32>, vector<8x256xf32> -> vector<72x256xf32>
    %cst_27 = arith.constant dense<0.000000e+00> : vector<8x256xf32>
    %127 = tpu.matmul %37, %126, %cst_27 {dimension_numbers = #tpu.dot_dimension_numbers<[1], [0], [0], [1], [0, 0, 1, 1], [], []>} : vector<8x72xf32>, vector<72x256xf32>, vector<8x256xf32> -> vector<8x256xf32>
    %128 = arith.mulf %127, %41 : vector<8x256xf32>
    %129 = arith.addf %128, %45 : vector<8x256xf32>
    %cst_28 = arith.constant 0.000000e+00 : f32
    %130 = vector.broadcast %cst_28 : f32 to vector<8x256xf32>
    %131 = arith.maximumf %129, %130 : vector<8x256xf32>
    %132 = arith.addf %6, %131 : vector<8x256xf32>
    %133 = vector.extract_strided_slice %132 {offsets = [0, 0], sizes = [8, 239], strides = [1, 1]} : vector<8x256xf32> to vector<8x239xf32>
    %134 = tpu.concatenate %10, %133 in 1 : vector<8x17xf32>, vector<8x239xf32> -> vector<8x256xf32>
    %135 = arith.mulf %134, %31 : vector<8x256xf32>
    %136 = vector.extract_strided_slice %132 {offsets = [0, 0], sizes = [8, 240], strides = [1, 1]} : vector<8x256xf32> to vector<8x240xf32>
    %137 = tpu.concatenate %9, %136 in 1 : vector<8x16xf32>, vector<8x240xf32> -> vector<8x256xf32>
    %138 = vector.extract_strided_slice %132 {offsets = [0, 0], sizes = [8, 241], strides = [1, 1]} : vector<8x256xf32> to vector<8x241xf32>
    %139 = tpu.concatenate %8, %138 in 1 : vector<8x15xf32>, vector<8x241xf32> -> vector<8x256xf32>
    %140 = arith.mulf %139, %35 : vector<8x256xf32>
    %141 = vector.extract_strided_slice %132 {offsets = [0, 0], sizes = [8, 255], strides = [1, 1]} : vector<8x256xf32> to vector<8x255xf32>
    %142 = tpu.concatenate %7, %141 in 1 : vector<8x1xf32>, vector<8x255xf32> -> vector<8x256xf32>
    %143 = arith.mulf %142, %31 : vector<8x256xf32>
    %144 = vector.extract_strided_slice %132 {offsets = [0, 1], sizes = [8, 255], strides = [1, 1]} : vector<8x256xf32> to vector<8x255xf32>
    %145 = tpu.concatenate %144, %7 in 1 : vector<8x255xf32>, vector<8x1xf32> -> vector<8x256xf32>
    %146 = arith.mulf %145, %35 : vector<8x256xf32>
    %147 = vector.extract_strided_slice %132 {offsets = [0, 15], sizes = [8, 241], strides = [1, 1]} : vector<8x256xf32> to vector<8x241xf32>
    %148 = tpu.concatenate %147, %8 in 1 : vector<8x241xf32>, vector<8x15xf32> -> vector<8x256xf32>
    %149 = arith.mulf %148, %31 : vector<8x256xf32>
    %150 = vector.extract_strided_slice %132 {offsets = [0, 16], sizes = [8, 240], strides = [1, 1]} : vector<8x256xf32> to vector<8x240xf32>
    %151 = tpu.concatenate %150, %9 in 1 : vector<8x240xf32>, vector<8x16xf32> -> vector<8x256xf32>
    %152 = vector.extract_strided_slice %132 {offsets = [0, 17], sizes = [8, 239], strides = [1, 1]} : vector<8x256xf32> to vector<8x239xf32>
    %153 = tpu.concatenate %152, %10 in 1 : vector<8x239xf32>, vector<8x17xf32> -> vector<8x256xf32>
    %154 = arith.mulf %153, %35 : vector<8x256xf32>
    %155 = tpu.concatenate %135, %137, %140, %143, %132, %146, %149, %151, %154 in 0 : vector<8x256xf32>, vector<8x256xf32>, vector<8x256xf32>, vector<8x256xf32>, vector<8x256xf32>, vector<8x256xf32>, vector<8x256xf32>, vector<8x256xf32>, vector<8x256xf32> -> vector<72x256xf32>
    %cst_29 = arith.constant dense<0.000000e+00> : vector<8x256xf32>
    %156 = tpu.matmul %37, %155, %cst_29 {dimension_numbers = #tpu.dot_dimension_numbers<[1], [0], [0], [1], [0, 0, 1, 1], [], []>} : vector<8x72xf32>, vector<72x256xf32>, vector<8x256xf32> -> vector<8x256xf32>
    %157 = arith.mulf %156, %41 : vector<8x256xf32>
    %158 = arith.addf %157, %45 : vector<8x256xf32>
    %cst_30 = arith.constant 0.000000e+00 : f32
    %159 = vector.broadcast %cst_30 : f32 to vector<8x256xf32>
    %160 = arith.maximumf %158, %159 : vector<8x256xf32>
    %c1 = arith.constant 1 : index
    %c0_31 = arith.constant 0 : index
    %c0_32 = arith.constant 0 : index
    %161 = vector.load %arg4[%c1, %c0_31, %c0_32] : memref<2x8x72xf32, #tpu.memory_space<vmem>>, vector<1x8x72xf32>
    %162 = vector.shape_cast %161 : vector<1x8x72xf32> to vector<8x72xf32>
    %c1_33 = arith.constant 1 : index
    %c0_34 = arith.constant 0 : index
    %c0_35 = arith.constant 0 : index
    %163 = vector.load %arg5[%c1_33, %c0_34, %c0_35] : memref<2x8x1xf32, #tpu.memory_space<vmem>>, vector<1x8x1xf32>
    %164 = vector.shape_cast %163 : vector<1x8x1xf32> to vector<8x1xf32>
    %165 = vector.shape_cast %164 : vector<8x1xf32> to vector<8x1xf32>
    %166 = vector.broadcast %165 : vector<8x1xf32> to vector<8x256xf32>
    %c1_36 = arith.constant 1 : index
    %c0_37 = arith.constant 0 : index
    %c0_38 = arith.constant 0 : index
    %167 = vector.load %arg6[%c1_36, %c0_37, %c0_38] : memref<2x8x1xf32, #tpu.memory_space<vmem>>, vector<1x8x1xf32>
    %168 = vector.shape_cast %167 : vector<1x8x1xf32> to vector<8x1xf32>
    %169 = vector.shape_cast %168 : vector<8x1xf32> to vector<8x1xf32>
    %170 = vector.broadcast %169 : vector<8x1xf32> to vector<8x256xf32>
    %171 = vector.extract_strided_slice %160 {offsets = [0, 0], sizes = [8, 239], strides = [1, 1]} : vector<8x256xf32> to vector<8x239xf32>
    %172 = tpu.concatenate %10, %171 in 1 : vector<8x17xf32>, vector<8x239xf32> -> vector<8x256xf32>
    %173 = arith.mulf %172, %31 : vector<8x256xf32>
    %174 = vector.extract_strided_slice %160 {offsets = [0, 0], sizes = [8, 240], strides = [1, 1]} : vector<8x256xf32> to vector<8x240xf32>
    %175 = tpu.concatenate %9, %174 in 1 : vector<8x16xf32>, vector<8x240xf32> -> vector<8x256xf32>
    %176 = vector.extract_strided_slice %160 {offsets = [0, 0], sizes = [8, 241], strides = [1, 1]} : vector<8x256xf32> to vector<8x241xf32>
    %177 = tpu.concatenate %8, %176 in 1 : vector<8x15xf32>, vector<8x241xf32> -> vector<8x256xf32>
    %178 = arith.mulf %177, %35 : vector<8x256xf32>
    %179 = vector.extract_strided_slice %160 {offsets = [0, 0], sizes = [8, 255], strides = [1, 1]} : vector<8x256xf32> to vector<8x255xf32>
    %180 = tpu.concatenate %7, %179 in 1 : vector<8x1xf32>, vector<8x255xf32> -> vector<8x256xf32>
    %181 = arith.mulf %180, %31 : vector<8x256xf32>
    %182 = vector.extract_strided_slice %160 {offsets = [0, 1], sizes = [8, 255], strides = [1, 1]} : vector<8x256xf32> to vector<8x255xf32>
    %183 = tpu.concatenate %182, %7 in 1 : vector<8x255xf32>, vector<8x1xf32> -> vector<8x256xf32>
    %184 = arith.mulf %183, %35 : vector<8x256xf32>
    %185 = vector.extract_strided_slice %160 {offsets = [0, 15], sizes = [8, 241], strides = [1, 1]} : vector<8x256xf32> to vector<8x241xf32>
    %186 = tpu.concatenate %185, %8 in 1 : vector<8x241xf32>, vector<8x15xf32> -> vector<8x256xf32>
    %187 = arith.mulf %186, %31 : vector<8x256xf32>
    %188 = vector.extract_strided_slice %160 {offsets = [0, 16], sizes = [8, 240], strides = [1, 1]} : vector<8x256xf32> to vector<8x240xf32>
    %189 = tpu.concatenate %188, %9 in 1 : vector<8x240xf32>, vector<8x16xf32> -> vector<8x256xf32>
    %190 = vector.extract_strided_slice %160 {offsets = [0, 17], sizes = [8, 239], strides = [1, 1]} : vector<8x256xf32> to vector<8x239xf32>
    %191 = tpu.concatenate %190, %10 in 1 : vector<8x239xf32>, vector<8x17xf32> -> vector<8x256xf32>
    %192 = arith.mulf %191, %35 : vector<8x256xf32>
    %193 = tpu.concatenate %173, %175, %178, %181, %160, %184, %187, %189, %192 in 0 : vector<8x256xf32>, vector<8x256xf32>, vector<8x256xf32>, vector<8x256xf32>, vector<8x256xf32>, vector<8x256xf32>, vector<8x256xf32>, vector<8x256xf32>, vector<8x256xf32> -> vector<72x256xf32>
    %cst_39 = arith.constant dense<0.000000e+00> : vector<8x256xf32>
    %194 = tpu.matmul %162, %193, %cst_39 {dimension_numbers = #tpu.dot_dimension_numbers<[1], [0], [0], [1], [0, 0, 1, 1], [], []>} : vector<8x72xf32>, vector<72x256xf32>, vector<8x256xf32> -> vector<8x256xf32>
    %195 = arith.mulf %194, %166 : vector<8x256xf32>
    %196 = arith.addf %195, %170 : vector<8x256xf32>
    %cst_40 = arith.constant 0.000000e+00 : f32
    %197 = vector.broadcast %cst_40 : f32 to vector<8x256xf32>
    %198 = arith.maximumf %196, %197 : vector<8x256xf32>
    %199 = arith.addf %160, %198 : vector<8x256xf32>
    %200 = vector.extract_strided_slice %199 {offsets = [0, 0], sizes = [8, 239], strides = [1, 1]} : vector<8x256xf32> to vector<8x239xf32>
    %201 = tpu.concatenate %10, %200 in 1 : vector<8x17xf32>, vector<8x239xf32> -> vector<8x256xf32>
    %202 = arith.mulf %201, %31 : vector<8x256xf32>
    %203 = vector.extract_strided_slice %199 {offsets = [0, 0], sizes = [8, 240], strides = [1, 1]} : vector<8x256xf32> to vector<8x240xf32>
    %204 = tpu.concatenate %9, %203 in 1 : vector<8x16xf32>, vector<8x240xf32> -> vector<8x256xf32>
    %205 = vector.extract_strided_slice %199 {offsets = [0, 0], sizes = [8, 241], strides = [1, 1]} : vector<8x256xf32> to vector<8x241xf32>
    %206 = tpu.concatenate %8, %205 in 1 : vector<8x15xf32>, vector<8x241xf32> -> vector<8x256xf32>
    %207 = arith.mulf %206, %35 : vector<8x256xf32>
    %208 = vector.extract_strided_slice %199 {offsets = [0, 0], sizes = [8, 255], strides = [1, 1]} : vector<8x256xf32> to vector<8x255xf32>
    %209 = tpu.concatenate %7, %208 in 1 : vector<8x1xf32>, vector<8x255xf32> -> vector<8x256xf32>
    %210 = arith.mulf %209, %31 : vector<8x256xf32>
    %211 = vector.extract_strided_slice %199 {offsets = [0, 1], sizes = [8, 255], strides = [1, 1]} : vector<8x256xf32> to vector<8x255xf32>
    %212 = tpu.concatenate %211, %7 in 1 : vector<8x255xf32>, vector<8x1xf32> -> vector<8x256xf32>
    %213 = arith.mulf %212, %35 : vector<8x256xf32>
    %214 = vector.extract_strided_slice %199 {offsets = [0, 15], sizes = [8, 241], strides = [1, 1]} : vector<8x256xf32> to vector<8x241xf32>
    %215 = tpu.concatenate %214, %8 in 1 : vector<8x241xf32>, vector<8x15xf32> -> vector<8x256xf32>
    %216 = arith.mulf %215, %31 : vector<8x256xf32>
    %217 = vector.extract_strided_slice %199 {offsets = [0, 16], sizes = [8, 240], strides = [1, 1]} : vector<8x256xf32> to vector<8x240xf32>
    %218 = tpu.concatenate %217, %9 in 1 : vector<8x240xf32>, vector<8x16xf32> -> vector<8x256xf32>
    %219 = vector.extract_strided_slice %199 {offsets = [0, 17], sizes = [8, 239], strides = [1, 1]} : vector<8x256xf32> to vector<8x239xf32>
    %220 = tpu.concatenate %219, %10 in 1 : vector<8x239xf32>, vector<8x17xf32> -> vector<8x256xf32>
    %221 = arith.mulf %220, %35 : vector<8x256xf32>
    %222 = tpu.concatenate %202, %204, %207, %210, %199, %213, %216, %218, %221 in 0 : vector<8x256xf32>, vector<8x256xf32>, vector<8x256xf32>, vector<8x256xf32>, vector<8x256xf32>, vector<8x256xf32>, vector<8x256xf32>, vector<8x256xf32>, vector<8x256xf32> -> vector<72x256xf32>
    %cst_41 = arith.constant dense<0.000000e+00> : vector<8x256xf32>
    %223 = tpu.matmul %162, %222, %cst_41 {dimension_numbers = #tpu.dot_dimension_numbers<[1], [0], [0], [1], [0, 0, 1, 1], [], []>} : vector<8x72xf32>, vector<72x256xf32>, vector<8x256xf32> -> vector<8x256xf32>
    %224 = arith.mulf %223, %166 : vector<8x256xf32>
    %225 = arith.addf %224, %170 : vector<8x256xf32>
    %cst_42 = arith.constant 0.000000e+00 : f32
    %226 = vector.broadcast %cst_42 : f32 to vector<8x256xf32>
    %227 = arith.maximumf %225, %226 : vector<8x256xf32>
    %228 = arith.addf %160, %227 : vector<8x256xf32>
    %229 = vector.extract_strided_slice %228 {offsets = [0, 0], sizes = [8, 239], strides = [1, 1]} : vector<8x256xf32> to vector<8x239xf32>
    %230 = tpu.concatenate %10, %229 in 1 : vector<8x17xf32>, vector<8x239xf32> -> vector<8x256xf32>
    %231 = arith.mulf %230, %31 : vector<8x256xf32>
    %232 = vector.extract_strided_slice %228 {offsets = [0, 0], sizes = [8, 240], strides = [1, 1]} : vector<8x256xf32> to vector<8x240xf32>
    %233 = tpu.concatenate %9, %232 in 1 : vector<8x16xf32>, vector<8x240xf32> -> vector<8x256xf32>
    %234 = vector.extract_strided_slice %228 {offsets = [0, 0], sizes = [8, 241], strides = [1, 1]} : vector<8x256xf32> to vector<8x241xf32>
    %235 = tpu.concatenate %8, %234 in 1 : vector<8x15xf32>, vector<8x241xf32> -> vector<8x256xf32>
    %236 = arith.mulf %235, %35 : vector<8x256xf32>
    %237 = vector.extract_strided_slice %228 {offsets = [0, 0], sizes = [8, 255], strides = [1, 1]} : vector<8x256xf32> to vector<8x255xf32>
    %238 = tpu.concatenate %7, %237 in 1 : vector<8x1xf32>, vector<8x255xf32> -> vector<8x256xf32>
    %239 = arith.mulf %238, %31 : vector<8x256xf32>
    %240 = vector.extract_strided_slice %228 {offsets = [0, 1], sizes = [8, 255], strides = [1, 1]} : vector<8x256xf32> to vector<8x255xf32>
    %241 = tpu.concatenate %240, %7 in 1 : vector<8x255xf32>, vector<8x1xf32> -> vector<8x256xf32>
    %242 = arith.mulf %241, %35 : vector<8x256xf32>
    %243 = vector.extract_strided_slice %228 {offsets = [0, 15], sizes = [8, 241], strides = [1, 1]} : vector<8x256xf32> to vector<8x241xf32>
    %244 = tpu.concatenate %243, %8 in 1 : vector<8x241xf32>, vector<8x15xf32> -> vector<8x256xf32>
    %245 = arith.mulf %244, %31 : vector<8x256xf32>
    %246 = vector.extract_strided_slice %228 {offsets = [0, 16], sizes = [8, 240], strides = [1, 1]} : vector<8x256xf32> to vector<8x240xf32>
    %247 = tpu.concatenate %246, %9 in 1 : vector<8x240xf32>, vector<8x16xf32> -> vector<8x256xf32>
    %248 = vector.extract_strided_slice %228 {offsets = [0, 17], sizes = [8, 239], strides = [1, 1]} : vector<8x256xf32> to vector<8x239xf32>
    %249 = tpu.concatenate %248, %10 in 1 : vector<8x239xf32>, vector<8x17xf32> -> vector<8x256xf32>
    %250 = arith.mulf %249, %35 : vector<8x256xf32>
    %251 = tpu.concatenate %231, %233, %236, %239, %228, %242, %245, %247, %250 in 0 : vector<8x256xf32>, vector<8x256xf32>, vector<8x256xf32>, vector<8x256xf32>, vector<8x256xf32>, vector<8x256xf32>, vector<8x256xf32>, vector<8x256xf32>, vector<8x256xf32> -> vector<72x256xf32>
    %cst_43 = arith.constant dense<0.000000e+00> : vector<8x256xf32>
    %252 = tpu.matmul %162, %251, %cst_43 {dimension_numbers = #tpu.dot_dimension_numbers<[1], [0], [0], [1], [0, 0, 1, 1], [], []>} : vector<8x72xf32>, vector<72x256xf32>, vector<8x256xf32> -> vector<8x256xf32>
    %253 = arith.mulf %252, %166 : vector<8x256xf32>
    %254 = arith.addf %253, %170 : vector<8x256xf32>
    %cst_44 = arith.constant 0.000000e+00 : f32
    %255 = vector.broadcast %cst_44 : f32 to vector<8x256xf32>
    %256 = arith.maximumf %254, %255 : vector<8x256xf32>
    %257 = arith.addf %160, %256 : vector<8x256xf32>
    %258 = vector.extract_strided_slice %257 {offsets = [0, 0], sizes = [8, 239], strides = [1, 1]} : vector<8x256xf32> to vector<8x239xf32>
    %259 = tpu.concatenate %10, %258 in 1 : vector<8x17xf32>, vector<8x239xf32> -> vector<8x256xf32>
    %260 = arith.mulf %259, %31 : vector<8x256xf32>
    %261 = vector.extract_strided_slice %257 {offsets = [0, 0], sizes = [8, 240], strides = [1, 1]} : vector<8x256xf32> to vector<8x240xf32>
    %262 = tpu.concatenate %9, %261 in 1 : vector<8x16xf32>, vector<8x240xf32> -> vector<8x256xf32>
    %263 = vector.extract_strided_slice %257 {offsets = [0, 0], sizes = [8, 241], strides = [1, 1]} : vector<8x256xf32> to vector<8x241xf32>
    %264 = tpu.concatenate %8, %263 in 1 : vector<8x15xf32>, vector<8x241xf32> -> vector<8x256xf32>
    %265 = arith.mulf %264, %35 : vector<8x256xf32>
    %266 = vector.extract_strided_slice %257 {offsets = [0, 0], sizes = [8, 255], strides = [1, 1]} : vector<8x256xf32> to vector<8x255xf32>
    %267 = tpu.concatenate %7, %266 in 1 : vector<8x1xf32>, vector<8x255xf32> -> vector<8x256xf32>
    %268 = arith.mulf %267, %31 : vector<8x256xf32>
    %269 = vector.extract_strided_slice %257 {offsets = [0, 1], sizes = [8, 255], strides = [1, 1]} : vector<8x256xf32> to vector<8x255xf32>
    %270 = tpu.concatenate %269, %7 in 1 : vector<8x255xf32>, vector<8x1xf32> -> vector<8x256xf32>
    %271 = arith.mulf %270, %35 : vector<8x256xf32>
    %272 = vector.extract_strided_slice %257 {offsets = [0, 15], sizes = [8, 241], strides = [1, 1]} : vector<8x256xf32> to vector<8x241xf32>
    %273 = tpu.concatenate %272, %8 in 1 : vector<8x241xf32>, vector<8x15xf32> -> vector<8x256xf32>
    %274 = arith.mulf %273, %31 : vector<8x256xf32>
    %275 = vector.extract_strided_slice %257 {offsets = [0, 16], sizes = [8, 240], strides = [1, 1]} : vector<8x256xf32> to vector<8x240xf32>
    %276 = tpu.concatenate %275, %9 in 1 : vector<8x240xf32>, vector<8x16xf32> -> vector<8x256xf32>
    %277 = vector.extract_strided_slice %257 {offsets = [0, 17], sizes = [8, 239], strides = [1, 1]} : vector<8x256xf32> to vector<8x239xf32>
    %278 = tpu.concatenate %277, %10 in 1 : vector<8x239xf32>, vector<8x17xf32> -> vector<8x256xf32>
    %279 = arith.mulf %278, %35 : vector<8x256xf32>
    %280 = tpu.concatenate %260, %262, %265, %268, %257, %271, %274, %276, %279 in 0 : vector<8x256xf32>, vector<8x256xf32>, vector<8x256xf32>, vector<8x256xf32>, vector<8x256xf32>, vector<8x256xf32>, vector<8x256xf32>, vector<8x256xf32>, vector<8x256xf32> -> vector<72x256xf32>
    %cst_45 = arith.constant dense<0.000000e+00> : vector<8x256xf32>
    %281 = tpu.matmul %162, %280, %cst_45 {dimension_numbers = #tpu.dot_dimension_numbers<[1], [0], [0], [1], [0, 0, 1, 1], [], []>} : vector<8x72xf32>, vector<72x256xf32>, vector<8x256xf32> -> vector<8x256xf32>
    %282 = arith.mulf %281, %166 : vector<8x256xf32>
    %283 = arith.addf %282, %170 : vector<8x256xf32>
    %cst_46 = arith.constant 0.000000e+00 : f32
    %284 = vector.broadcast %cst_46 : f32 to vector<8x256xf32>
    %285 = arith.maximumf %283, %284 : vector<8x256xf32>
    %286 = arith.addf %6, %285 : vector<8x256xf32>
    %c0_47 = arith.constant 0 : index
    %c0_48 = arith.constant 0 : index
    %c0_49 = arith.constant 0 : index
    %287 = vector.load %arg7[%c0_47, %c0_48, %c0_49] : memref<1x8x256xf32, #tpu.memory_space<vmem>>, vector<1x8x256xf32>
    %288 = vector.shape_cast %287 : vector<1x8x256xf32> to vector<8x256xf32>
    %289 = vector.shape_cast %286 : vector<8x256xf32> to vector<1x8x256xf32>
    tpu.vector_store %arg7[%c0_47, %c0_48, %c0_49], %289 {strides = array<i32>} : memref<1x8x256xf32, #tpu.memory_space<vmem>>, vector<1x8x256xf32>,
    return
  }
  func.func @transform_0(%arg0: i32) -> (i32, i32, i32) {
    %c0_i32 = arith.constant 0 : i32
    %c0_i32_0 = arith.constant 0 : i32
    %c0_i32_1 = arith.constant 0 : i32
    return %arg0, %c0_i32, %c0_i32_0 : i32, i32, i32
  }
  func.func @transform_1(%arg0: i32) -> (i32, i32) {
    %c0_i32 = arith.constant 0 : i32
    %c0_i32_0 = arith.constant 0 : i32
    %c0_i32_1 = arith.constant 0 : i32
    return %c0_i32, %c0_i32_0 : i32, i32
  }
  func.func @transform_2(%arg0: i32) -> (i32, i32) {
    %c0_i32 = arith.constant 0 : i32
    %c0_i32_0 = arith.constant 0 : i32
    %c0_i32_1 = arith.constant 0 : i32
    return %c0_i32, %c0_i32_0 : i32, i32
  }
  func.func @transform_3(%arg0: i32) -> (i32, i32, i32) {
    %c0_i32 = arith.constant 0 : i32
    %c0_i32_0 = arith.constant 0 : i32
    %c0_i32_1 = arith.constant 0 : i32
    %c0_i32_2 = arith.constant 0 : i32
    return %c0_i32, %c0_i32_0, %c0_i32_1 : i32, i32, i32
  }
  func.func @transform_4(%arg0: i32) -> (i32, i32, i32) {
    %c0_i32 = arith.constant 0 : i32
    %c0_i32_0 = arith.constant 0 : i32
    %c0_i32_1 = arith.constant 0 : i32
    %c0_i32_2 = arith.constant 0 : i32
    return %c0_i32, %c0_i32_0, %c0_i32_1 : i32, i32, i32
  }
  func.func @transform_5(%arg0: i32) -> (i32, i32, i32) {
    %c0_i32 = arith.constant 0 : i32
    %c0_i32_0 = arith.constant 0 : i32
    %c0_i32_1 = arith.constant 0 : i32
    %c0_i32_2 = arith.constant 0 : i32
    return %c0_i32, %c0_i32_0, %c0_i32_1 : i32, i32, i32
  }
  func.func @transform_6(%arg0: i32) -> (i32, i32, i32) {
    %c0_i32 = arith.constant 0 : i32
    %c0_i32_0 = arith.constant 0 : i32
    %c0_i32_1 = arith.constant 0 : i32
    return %arg0, %c0_i32, %c0_i32_0 : i32, i32, i32
  }
}

</mosaic_0001>

<bundles_post_ra>
// kernel: tpu_custom_call.1
= control target key start
LH: loop header
LB: loop body
LE: loop exit
PB: predicated region body
PF: predicated region fallthrough
CT: control target
= control target key end

     0   :  { %11 = vsyncpa [#allocation3], 0  ;;  %s2880_s0 = inlined_call_operand.vmem [shape: f32[2,4,256], index: 0, kind: input, shape index: {}]   ;;  %s2881_s1 = inlined_call_operand.vmem [shape: f32[8,4], index: 1, kind: input, shape index: {}]   ;;  %s2882_s2 = inlined_call_operand.vmem [shape: f32[8,1], index: 2, kind: input, shape index: {}]   ;;  %s2883_s3 = inlined_call_operand.vmem [shape: f32[2,8,72], index: 3, kind: input, shape index: {}]   ;;  %s2884_s4 = inlined_call_operand.vmem [shape: f32[2,8,1], index: 4, kind: input, shape index: {}]   ;;  %s2885_s5 = inlined_call_operand.vmem [shape: f32[2,8,1], index: 5, kind: input, shape index: {}]   ;;  %s2886_s6 = inlined_call_operand.hbm [shape: f32[2,8,256], index: 6, kind: output, shape index: {}]  }
   0x1   :  { %13 = vsyncpa [#allocation3 + $0x1], 0  ;;  %s2197_s21 = smov 0   ;;  %s2199_s22 = smov 0  }
   0x2   :  { %s2201_s23 = smov 0   ;;  %s2203_s24 = smov 0  }
   0x3 LB: > { %s2218_s25 = sadd.s32 4294967295, %s2148_s24   ;;  %s1753_s26 = sadd.s32 4294967294, %s2148_s24   ;;  %s2148_s24 = sphi %s2203_s24, %s2896_s24   ;;  %s2144_s23 = sphi %s2201_s23, %s2895_s23   ;;  %s2140_s22 = sphi %s2199_s22, %s2894_s22   ;;  %s2136_s21 = sphi %s2197_s21, %s2893_s21  }
   0x4   : > { %s2222_s27 = sadd.s32 1, %s2148_s24   ;;  %s157_s28 = sadd.s32 1, %s2144_s23 }
   0x5   : > { %s154_s29 = ssub.s32 %s2148_s24, %s2222_s27  ;;  %p167_p0 = scmp.ne.s32.totalorder %s2144_s23, %s2140_s22 }
   0x6   : > { %p155_p1 = scmp.eq.s32.totalorder %s154_s29, 0  ;;  %p168_p2 = scmp.eq.s32.totalorder %s2218_s25, 1 }
   0x7   : > { %p173_p3 = scmp.ne.s32.totalorder %s2140_s22, %s2136_s21  ;;  %p174_p4 = scmp.eq.s32.totalorder %s1753_s26, 1 }
   0x8   : > { %s2233_s30 = scalar_select %p155_p1, %s2144_s23, %s157_s28  }
   0x9   : > { %p2235_p5 = por %p168_p2, %p167_p0  ;;  %p2239_p6 = por %p174_p4, %p173_p3 }
   0xa   : > { %p1756_p7 = scmp.ge.s32.totalorder %s2148_s24, 1  ;;  %p215_p8 = scmp.lt.s32.totalorder %s2148_s24, 3 }
   0xc   : > { %p216_p9 = pnand %p1756_p7, %p215_p8 }
   0xd   : > { %p245_p10 = scmp.lt.s32.totalorder (!%p216_p9), %s2218_s25, 1  ;;  %v252_v0 = vld [vmem:[%s2882_s2] sm:$0xff] (!%p216_p9)  ;;  %v2150_v1 = vmov (!%p216_p9), 0.0   ;;  %v2151_v2 = vmov (!%p216_p9), 0   ;;  %vm264_vm0 = vcmask (!%p216_p9), 1043456   ;;  %vm260_vm1 = vcmask (!%p216_p9), 31744  }
   0xe   : > { %219 = sbr.rel (%p216_p9) target bundleno = 3186 (0xc72), region = 44  ;;  %333 = vmatprep.mubr.f32.mxu0 (!%p216_p9), %v2150_v1  ;;  %546 = vmatprep.mubr.f32.mxu1 (!%p216_p9), %v2150_v1  ;;  %v250_v5 = vld [vmem:[%s2881_s1] sm:$0xff] (!%p216_p9)  ;;  %s2152_s18 = smov (!%p216_p9), 17   ;;  %v340_v14 = vlaneseq (!%p216_p9)  ;;  %vm398_vm3 = vcmask (!%p216_p9), 138240   ;;  %vm409_vm5 = vcmask (!%p216_p9), 130048   ;;  %vm429_vm7 = vcmask (!%p216_p9), 7168  }
   0xf   : > { %2003 = vset.pattern.permute.xlu0 (!%p216_p9), %v2151_v2  ;;  %2014 = vset.pattern.permute.xlu1 (!%p216_p9), %v2151_v2  ;;  %s2153_s19 = smov (!%p216_p9), 15   ;;  %s2154_s20 = smov (!%p216_p9), 16   ;;  %v386_v12 = vld [vmem:[%s2885_s5] sm:$0xff] (!%p216_p9)  ;;  %vm1767_vm6 = vmneg (!%p216_p9), %vm409_vm5  ;;  %vm2160_vm9 = vmmov (!%p216_p9), 1   ;;  %vm418_vm12 = vcmask (!%p216_p9), 121856   ;;  %vm440_vm13 = vcmask (!%p216_p9), 1039360  }
  0x10   : > { %255 = vperm.xlu0 (!%p216_p9), %2003, %v252_v0   ;;  %s2155_s26 = smov (!%p216_p9), 1   ;;  %s2156_s28 = smov (!%p216_p9), 127   ;;  %v380_v13 = vld [vmem:[%s2884_s4] sm:$0xff] (!%p216_p9)  ;;  %v341_v15 = vand.u32 (!%p216_p9), 127, %v340_v14  ;;  %vm2310_vm10 = vmpackc.low (!%p216_p9), %vm1767_vm6, %vm2160_vm9  ;;  %vm451_vm14 = vcmask (!%p216_p9), 924672   ;;  %vm462_vm15 = vcmask (!%p216_p9), 916480  }
  0x11   : > { %s2157_s29 = smov (!%p216_p9), 113   ;;  %s2158_s9 = smov (!%p216_p9), 112  }
  0x12   : > { %s2159_s10 = smov (!%p216_p9), 111   ;;  %v342_v16 = vadd.s32 (!%p216_p9), 128, %v341_v15  ;;  %v347_v18 = vand.u32 (!%p216_p9), 15, %v341_v15  ;;  %s2161_s17 = smov (!%p216_p9), [#allocation2]  }
  0x14   : > { %v354_v17 = vand.u32 (!%p216_p9), 15, %v342_v16  ;;  %vm367_vm4 = vcmp.ge.s32.totalorder (!%p216_p9), %v347_v18, 1  ;;  %vm373_vm11 = vcmp.le.s32.totalorder (!%p216_p9), %v347_v18, 14  ;;  %v2356_v16 = vld [vmem:[%s2883_s3] sm:$0xff] (!%p216_p9) }
  0x15   : > { %s246_s11 = scalar_select %p245_p10, %s2218_s25, 1  ;;  %v2302_v24 = vsel %vm367_vm4, 1.0, %v2150_v1  ;;  %v2322_v41 = vsel %vm373_vm11, 1.0, %v2150_v1 }
  0x16   : > { %vm368_vm2 = vcmp.ge.s32.totalorder %v354_v17, 1  ;;  %vm374_vm8 = vcmp.le.s32.totalorder %v354_v17, 14 }
  0x17   : > { %s1807_s12 = sshll.u32 %s246_s11, 3  ;;  %v2298_v21 = vsel %vm368_vm2, 1.0, %v2150_v1  ;;  %v2316_v38 = vsel %vm374_vm8, 1.0, %v2150_v1  ;;  %vm478_vm2 = vcmask 588800   ;;  %s2090_s11 = sshll.u32 %s2161_s17, 4  ;;  %s2091_s11 = int_to_ptr.vmem [resolvable:$false] %s2090_s11 }
  0x18   : > { %s249_s15 = scalar_lea.vmem %s2880_s0, %s1807_s12  ;;  %s2092_s12 = scalar_lea.vmem %s2091_s11, 512 }
  0x19   : > { %v251_v3 = vld [vmem:[%s249_s15] sm:$0xff] }
  0x1a   : > { %v259_v4 = vcombine.high %v251_v3, %v251_v3 }
  0x1c   : > { %1760 = vmatprep.subr.msk.mxu0 %vm264_vm0, %v259_v4 }
  0x1d   : > { %1761 = vmatpush1.msk.msra.mxu0 %vm264_vm0, %v251_v3  ;;  %vm2341_vm0 = vmpackc.low %vm462_vm15, %vm2160_vm9 }
  0x1e   : > { %1762 = vmatmul.mubr.msk.f32.vlgmr.msra.gmra.mrb[0].mxu0 %vm260_vm1, %v250_v5  ;;  %vm471_vm1 = vcmask 908288  }
  0x1f   : > { %703 = vmatprep.mubr.f32.mxu0 %v2150_v1 }
  0x8f   : > { %v256_v6 = vpop.permute.xlu0 %255 }
  0xf1   : > { %v335_v7 = vpop.f32.mrb[0].mxu0 }
  0xf2   : > { %v2259_v8 = vadd.f32 %v335_v7, %v256_v6  ;;  %v337_v9 = vpop.f32.mrb[1].mxu0 }
  0xf3   : > { %v2261_v10 = vadd.f32 %v337_v9, %v256_v6 }
  0xf4   : > { %394 = vrot.lane.b32.xlu0 %v2259_v8, %s2152_s18 }
  0xf5   : > { %396 = vrot.lane.b32.xlu1 %v2261_v10, %s2152_s18  ;;  %v2004_v11 = vpack.i.bf16 %v2261_v10, %v2259_v8 }
  0xf8   : > { %414 = vrot.lane.b32.xlu0 %v2259_v8, %s2153_s19 }
  0xf9   : > { %2005 = vrot.lane.b32.xlu1 %v2004_v11, %s2154_s20 }
  0xfc   : > { %425 = vrot.lane.b32.xlu0 %v2259_v8, %s2155_s26 }
  0xfd   : > { %416 = vrot.lane.b32.xlu1 %v2261_v10, %s2153_s19 }
 0x100   : > { %438 = vrot.lane.b32.xlu0 %v2261_v10, %s2156_s28 }
 0x101   : > { %427 = vrot.lane.b32.xlu1 %v2261_v10, %s2155_s26 }
 0x104   : > { %449 = vrot.lane.b32.xlu0 %v2261_v10, %s2157_s29 }
 0x105   : > { %436 = vrot.lane.b32.xlu1 %v2259_v8, %s2156_s28 }
 0x108   : > { %2010 = vrot.lane.b32.xlu0 %v2004_v11, %s2158_s9 }
 0x109   : > { %447 = vrot.lane.b32.xlu1 %v2259_v8, %s2157_s29 }
 0x10c   : > { %467 = vrot.lane.b32.xlu0 %v2259_v8, %s2159_s10 }
 0x10d   : > { %469 = vrot.lane.b32.xlu1 %v2261_v10, %s2159_s10 }
 0x110   : > { %389 = vperm.xlu0 %2003, %v386_v12  }
 0x111   : > { %383 = vperm.xlu1 %2014, %v380_v13  }
 0x166   : > { %v395_v19 = vpop.permute.xlu0 %394 }
 0x167   : > { %v397_v20 = vpop.permute.xlu1 %396  ;;  %v402_v25 = vsel %vm398_vm3, 0.0, %v395_v19 }
 0x168   : > { %v399_v22 = vsel %vm398_vm3, %v395_v19, %v397_v20  ;;  %v403_v30 = vmul.f32 %v2302_v24, %v402_v25 }
 0x169   : > { %v404_v29 = vmul.f32 %v2298_v21, %v399_v22 }
 0x16a   : > { %v415_v23 = vpop.permute.xlu0 %414 }
 0x16b   : > { %v2006_v26 = vpop.permute.xlu1 %2005  ;;  %v422_v42 = vsel %vm418_vm12, 0.0, %v415_v23 }
 0x16c   : > { %v2008_v27 = vunpack.i.h.bf16 %v2006_v26  ;;  %v2007_v28 = vunpack.i.l.bf16 %v2006_v26  ;;  %v423_v50 = vmul.f32 %v2322_v41, %v422_v42 }
 0x16e   : > { %v426_v31 = vpop.permute.xlu0 %425  ;;  %v410_v32 = vsel %vm409_vm5, %v2007_v28, %v2008_v27  ;;  %v1811_v36 = vpack.c.bf16 %v2007_v28, %v403_v30 }
 0x16f   : > { %v417_v33 = vpop.permute.xlu1 %416  ;;  %v1809_v34 = vpack.c.bf16 %v410_v32, %v404_v29  ;;  %v433_v37 = vsel %vm429_vm7, 0.0, %v426_v31 }
 0x170   : > { %v419_v39 = vsel %vm418_vm12, %v415_v23, %v417_v33  ;;  %v434_v45 = vmul.f32 %v2302_v24, %v433_v37 }
 0x171   : > { %1810 = vmatprep.subr.bf16.mxu1 %v1809_v34  ;;  %v424_v47 = vmul.f32 %v2316_v38, %v419_v39 }
 0x172   : > { %1813 = vmatpush1.bf16.msk.msra.mxu1 %vm2310_vm10, %v1811_v36  ;;  %v439_v40 = vpop.permute.xlu0 %438  ;;  %v1816_v56 = vpack.c.bf16 %v434_v45, %v423_v50 }
 0x173   : > { %v444_v43 = vsel %vm440_vm13, %v439_v40, 0.0  ;;  %v428_v44 = vpop.permute.xlu1 %427 }
 0x174   : > { %v430_v46 = vsel %vm429_vm7, %v426_v31, %v428_v44  ;;  %v446_v48 = vmul.f32 %v2316_v38, %v444_v43 }
 0x175   : > { %v435_v49 = vmul.f32 %v2298_v21, %v430_v46 }
 0x176   : > { %v450_v51 = vpop.permute.xlu0 %449  ;;  %v1818_v58 = vpack.c.bf16 %v446_v48, %v2261_v10 }
 0x177   : > { %v437_v52 = vpop.permute.xlu1 %436  ;;  %v1814_v53 = vpack.c.bf16 %v435_v49, %v424_v47  ;;  %v455_v54 = vsel %vm451_vm14, %v450_v51, 0.0 }
 0x178   : > { %v441_v55 = vsel %vm440_vm13, %v437_v52, %v439_v40  ;;  %v457_v60 = vmul.f32 %v2298_v21, %v455_v54 }
 0x179   : > { %v445_v57 = vmul.f32 %v2322_v41, %v441_v55  ;;  %1815 = vmatprep.subr.bf16.mxu1 %v1814_v53 }
 0x17a   : > { %1817 = vmatpush1.bf16.msra.mxu1 %v1816_v56  ;;  %v2011_v59 = vpop.permute.xlu0 %2010 }
 0x17b   : > { %v2013_v61 = vunpack.i.h.bf16 %v2011_v59  ;;  %v2012_v62 = vunpack.i.l.bf16 %v2011_v59  ;;  %v448_v63 = vpop.permute.xlu1 %447  ;;  %1819 = vmatprep.subr.bf16.mxu1 %v1818_v58  ;;  %v1820_v0 = vpack.c.bf16 %v445_v57, %v2259_v8 }
 0x17c   : > { %v452_v2 = vsel %vm451_vm14, %v448_v63, %v450_v51 }
 0x17d   : > { %v1822_v4 = vpack.c.bf16 %v2013_v61, %v457_v60  ;;  %v456_v5 = vmul.f32 %v2302_v24, %v452_v2  ;;  %v463_v6 = vsel %vm462_vm15, %v2012_v62, %v2013_v61 }
 0x17e   : > { %1821 = vmatpush1.bf16.msra.mxu1 %v1820_v0  ;;  %v468_v7 = vpop.permute.xlu0 %467 }
 0x17f   : > { %v470_v9 = vpop.permute.xlu1 %469  ;;  %1824 = vmatprep.subr.msk.bf16.mxu1 %vm2341_vm0, %v1822_v4  ;;  %v1825_v11 = vpack.c.bf16 %v463_v6, %v456_v5 }
 0x180   : > { %v475_v12 = vsel %vm471_vm1, %v470_v9, 0.0  ;;  %v472_v13 = vsel %vm471_vm1, %v468_v7, %v470_v9 }
 0x181   : > { %v477_v14 = vmul.f32 %v2316_v38, %v475_v12  ;;  %v476_v15 = vmul.f32 %v2322_v41, %v472_v13 }
 0x182   : > { %1826 = vmatpush1.bf16.msra.mxu1 %v1825_v11 }
 0x183   : > { %498 = vmatprep.subr.mxu1 %v477_v14 }
 0x186   : > { %499 = vmatpush1.msra.mxu1 %v476_v15 }
 0x187   : > { %1770 = vmatmul.mubr.msk.f32.vlgmr.msra.gmra.mrb[0].mxu1 %vm478_vm2, %v2356_v16 }
 0x188   : > { %860 = vmatprep.mubr.f32.mxu1 %v2150_v1 }
 0x18f   : > { %v2364_v22 = vpop.permute.xlu0 %389 }
 0x190   : > { %v2361_v17 = vpop.permute.xlu1 %383 }
 0x25a   : > { %v548_v18 = vpop.f32.mrb[0].mxu1 }
 0x25b   : > { %v553_v19 = vmul.f32 %v548_v18, %v2361_v17  ;;  %v550_v20 = vpop.f32.mrb[1].mxu1 }
 0x25c   : > { %v554_v23 = vmul.f32 %v550_v20, %v2361_v17 }
 0x25d   : > { %v555_v25 = vadd.f32 %v553_v19, %v2364_v22 }
 0x25e   : > { %v556_v26 = vadd.f32 %v554_v23, %v2364_v22 }
 0x25f   : > { %v557_v27 = vmax.f32 %v555_v25, 0.0 }
 0x260   : > { %v558_v28 = vmax.f32 %v556_v26, 0.0 }
 0x261   : > { %v2370_v29 = vadd.f32 %v557_v27, %v2259_v8 }
 0x262   : > { %v560_v30 = vadd.f32 %v558_v28, %v2261_v10 }
 0x263   : > { %581 = vrot.lane.b32.xlu0 %v2370_v29, %s2153_s19  ;;  %563 = vrot.lane.b32.xlu1 %v2370_v29, %s2152_s18 }
 0x264   : > { %v2015_v31 = vpack.i.bf16 %v560_v30, %v2370_v29 }
 0x267   : > { %2016 = vrot.lane.b32.xlu1 %v2015_v31, %s2154_s20  ;;  %565 = vrot.lane.b32.xlu0 %v560_v30, %s2152_s18 }
 0x26b   : > { %583 = vrot.lane.b32.xlu1 %v560_v30, %s2153_s19  ;;  %591 = vrot.lane.b32.xlu0 %v2370_v29, %s2155_s26 }
 0x26f   : > { %593 = vrot.lane.b32.xlu1 %v560_v30, %s2155_s26  ;;  %603 = vrot.lane.b32.xlu0 %v560_v30, %s2156_s28 }
 0x273   : > { %601 = vrot.lane.b32.xlu1 %v2370_v29, %s2156_s28  ;;  %613 = vrot.lane.b32.xlu0 %v560_v30, %s2157_s29 }
 0x277   : > { %611 = vrot.lane.b32.xlu1 %v2370_v29, %s2157_s29  ;;  %2021 = vrot.lane.b32.xlu0 %v2015_v31, %s2158_s9 }
 0x27b   : > { %631 = vrot.lane.b32.xlu1 %v560_v30, %s2159_s10  ;;  %629 = vrot.lane.b32.xlu0 %v2370_v29, %s2159_s10 }
 0x2d5   : > { %v582_v32 = vpop.permute.xlu0 %581  ;;  %v564_v33 = vpop.permute.xlu1 %563 }
 0x2d6   : > { %v570_v34 = vsel %vm398_vm3, 0.0, %v564_v33  ;;  %v588_v52 = vsel %vm418_vm12, 0.0, %v582_v32 }
 0x2d7   : > { %v571_v44 = vmul.f32 %v2302_v24, %v570_v34  ;;  %v589_v61 = vmul.f32 %v2322_v41, %v588_v52 }
 0x2d9   : > { %v2017_v36 = vpop.permute.xlu1 %2016  ;;  %v566_v37 = vpop.permute.xlu0 %565 }
 0x2da   : > { %v2019_v39 = vunpack.i.h.bf16 %v2017_v36  ;;  %v2018_v40 = vunpack.i.l.bf16 %v2017_v36  ;;  %v567_v42 = vsel %vm398_vm3, %v564_v33, %v566_v37 }
 0x2db   : > { %v572_v43 = vmul.f32 %v2298_v21, %v567_v42 }
 0x2dc   : > { %v577_v45 = vsel %vm409_vm5, %v2018_v40, %v2019_v39  ;;  %v1829_v49 = vpack.c.bf16 %v2018_v40, %v571_v44 }
 0x2dd   : > { %v584_v46 = vpop.permute.xlu1 %583  ;;  %v592_v47 = vpop.permute.xlu0 %591  ;;  %v1827_v48 = vpack.c.bf16 %v577_v45, %v572_v43 }
 0x2de   : > { %v598_v50 = vsel %vm429_vm7, 0.0, %v592_v47  ;;  %v585_v51 = vsel %vm418_vm12, %v582_v32, %v584_v46 }
 0x2df   : > { %1828 = vmatprep.subr.bf16.mxu0 %v1827_v48  ;;  %v599_v55 = vmul.f32 %v2302_v24, %v598_v50  ;;  %v590_v58 = vmul.f32 %v2316_v38, %v585_v51 }
 0x2e0   : > { %1831 = vmatpush1.bf16.msk.msra.mxu0 %vm2310_vm10, %v1829_v49 }
 0x2e1   : > { %v594_v53 = vpop.permute.xlu1 %593  ;;  %v604_v54 = vpop.permute.xlu0 %603  ;;  %v1834_v2 = vpack.c.bf16 %v599_v55, %v589_v61 }
 0x2e2   : > { %v595_v56 = vsel %vm429_vm7, %v592_v47, %v594_v53  ;;  %v608_v57 = vsel %vm440_vm13, %v604_v54, 0.0 }
 0x2e3   : > { %v600_v59 = vmul.f32 %v2298_v21, %v595_v56  ;;  %v610_v60 = vmul.f32 %v2316_v38, %v608_v57 }
 0x2e5   : > { %v602_v62 = vpop.permute.xlu1 %601  ;;  %v614_v63 = vpop.permute.xlu0 %613  ;;  %v1832_v0 = vpack.c.bf16 %v600_v59, %v590_v58  ;;  %v1836_v7 = vpack.c.bf16 %v610_v60, %v560_v30 }
 0x2e6   : > { %v605_v4 = vsel %vm440_vm13, %v602_v62, %v604_v54  ;;  %v618_v6 = vsel %vm451_vm14, %v614_v63, 0.0 }
 0x2e7   : > { %v609_v5 = vmul.f32 %v2322_v41, %v605_v4  ;;  %1833 = vmatprep.subr.bf16.mxu0 %v1832_v0  ;;  %v620_v13 = vmul.f32 %v2298_v21, %v618_v6 }
 0x2e8   : > { %1835 = vmatpush1.bf16.msra.mxu0 %v1834_v2 }
 0x2e9   : > { %v1838_v9 = vpack.c.bf16 %v609_v5, %v2370_v29  ;;  %v612_v11 = vpop.permute.xlu1 %611  ;;  %1837 = vmatprep.subr.bf16.mxu0 %v1836_v7  ;;  %v2022_v12 = vpop.permute.xlu0 %2021 }
 0x2ea   : > { %v615_v14 = vsel %vm451_vm14, %v612_v11, %v614_v63  ;;  %v2024_v15 = vunpack.i.h.bf16 %v2022_v12  ;;  %v2023_v18 = vunpack.i.l.bf16 %v2022_v12 }
 0x2eb   : > { %v619_v19 = vmul.f32 %v2302_v24, %v615_v14 }
 0x2ec   : > { %v1840_v20 = vpack.c.bf16 %v2024_v15, %v620_v13  ;;  %v625_v23 = vsel %vm462_vm15, %v2023_v18, %v2024_v15  ;;  %1839 = vmatpush1.bf16.msra.mxu0 %v1838_v9 }
 0x2ed   : > { %v1843_v25 = vpack.c.bf16 %v625_v23, %v619_v19  ;;  %v632_v26 = vpop.permute.xlu1 %631  ;;  %v630_v27 = vpop.permute.xlu0 %629 }
 0x2ee   : > { %v636_v28 = vsel %vm471_vm1, %v632_v26, 0.0  ;;  %1842 = vmatprep.subr.msk.bf16.mxu0 %vm2341_vm0, %v1840_v20  ;;  %v633_v30 = vsel %vm471_vm1, %v630_v27, %v632_v26 }
 0x2ef   : > { %v638_v29 = vmul.f32 %v2316_v38, %v636_v28  ;;  %v637_v31 = vmul.f32 %v2322_v41, %v633_v30 }
 0x2f0   : > { %1844 = vmatpush1.bf16.msra.mxu0 %v1843_v25 }
 0x2f1   : > { %655 = vmatprep.subr.mxu0 %v638_v29 }
 0x2f4   : > { %656 = vmatpush1.msra.mxu0 %v637_v31 }
 0x2f5   : > { %1774 = vmatmul.mubr.msk.f32.vlgmr.msra.gmra.mrb[2].mxu0 %vm478_vm2, %v2356_v16 }
 0x2f6   : > { %1017 = vmatprep.mubr.f32.mxu0 %v2150_v1 }
 0x3c8   : > { %v705_v32 = vpop.f32.mrb[2].mxu0 }
 0x3c9   : > { %v710_v33 = vmul.f32 %v705_v32, %v2361_v17  ;;  %v707_v34 = vpop.f32.mrb[3].mxu0 }
 0x3ca   : > { %v711_v36 = vmul.f32 %v707_v34, %v2361_v17 }
 0x3cb   : > { %v712_v37 = vadd.f32 %v710_v33, %v2364_v22 }
 0x3cc   : > { %v713_v39 = vadd.f32 %v711_v36, %v2364_v22 }
 0x3cd   : > { %v714_v40 = vmax.f32 %v712_v37, 0.0 }
 0x3ce   : > { %v715_v42 = vmax.f32 %v713_v39, 0.0 }
 0x3cf   : > { %v2433_v43 = vadd.f32 %v714_v40, %v2259_v8 }
 0x3d0   : > { %v717_v44 = vadd.f32 %v715_v42, %v2261_v10 }
 0x3d1   : > { %738 = vrot.lane.b32.xlu0 %v2433_v43, %s2153_s19  ;;  %720 = vrot.lane.b32.xlu1 %v2433_v43, %s2152_s18 }
 0x3d2   : > { %v2025_v45 = vpack.i.bf16 %v717_v44, %v2433_v43 }
 0x3d5   : > { %2026 = vrot.lane.b32.xlu1 %v2025_v45, %s2154_s20  ;;  %722 = vrot.lane.b32.xlu0 %v717_v44, %s2152_s18 }
 0x3d9   : > { %740 = vrot.lane.b32.xlu1 %v717_v44, %s2153_s19  ;;  %748 = vrot.lane.b32.xlu0 %v2433_v43, %s2155_s26 }
 0x3dd   : > { %750 = vrot.lane.b32.xlu1 %v717_v44, %s2155_s26  ;;  %760 = vrot.lane.b32.xlu0 %v717_v44, %s2156_s28 }
 0x3e1   : > { %758 = vrot.lane.b32.xlu1 %v2433_v43, %s2156_s28  ;;  %770 = vrot.lane.b32.xlu0 %v717_v44, %s2157_s29 }
 0x3e5   : > { %768 = vrot.lane.b32.xlu1 %v2433_v43, %s2157_s29  ;;  %2031 = vrot.lane.b32.xlu0 %v2025_v45, %s2158_s9 }
 0x3e9   : > { %788 = vrot.lane.b32.xlu1 %v717_v44, %s2159_s10  ;;  %786 = vrot.lane.b32.xlu0 %v2433_v43, %s2159_s10 }
 0x443   : > { %v739_v46 = vpop.permute.xlu0 %738  ;;  %v721_v47 = vpop.permute.xlu1 %720 }
 0x444   : > { %v727_v48 = vsel %vm398_vm3, 0.0, %v721_v47  ;;  %v745_v63 = vsel %vm418_vm12, 0.0, %v739_v46 }
 0x445   : > { %v728_v55 = vmul.f32 %v2302_v24, %v727_v48  ;;  %v746_v12 = vmul.f32 %v2322_v41, %v745_v63 }
 0x447   : > { %v2027_v49 = vpop.permute.xlu1 %2026  ;;  %v723_v50 = vpop.permute.xlu0 %722 }
 0x448   : > { %v2029_v51 = vunpack.i.h.bf16 %v2027_v49  ;;  %v2028_v52 = vunpack.i.l.bf16 %v2027_v49  ;;  %v724_v53 = vsel %vm398_vm3, %v721_v47, %v723_v50 }
 0x449   : > { %v729_v54 = vmul.f32 %v2298_v21, %v724_v53 }
 0x44a   : > { %v734_v56 = vsel %vm409_vm5, %v2028_v52, %v2029_v51  ;;  %v1847_v60 = vpack.c.bf16 %v2028_v52, %v728_v55 }
 0x44b   : > { %v741_v57 = vpop.permute.xlu1 %740  ;;  %v749_v58 = vpop.permute.xlu0 %748  ;;  %v1845_v59 = vpack.c.bf16 %v734_v56, %v729_v54 }
 0x44c   : > { %v755_v61 = vsel %vm429_vm7, 0.0, %v749_v58  ;;  %v742_v62 = vsel %vm418_vm12, %v739_v46, %v741_v57 }
 0x44d   : > { %1846 = vmatprep.subr.bf16.mxu1 %v1845_v59  ;;  %v756_v4 = vmul.f32 %v2302_v24, %v755_v61  ;;  %v747_v7 = vmul.f32 %v2316_v38, %v742_v62 }
 0x44e   : > { %1849 = vmatpush1.bf16.msk.msra.mxu1 %vm2310_vm10, %v1847_v60 }
 0x44f   : > { %v751_v0 = vpop.permute.xlu1 %750  ;;  %v761_v2 = vpop.permute.xlu0 %760  ;;  %v1852_v18 = vpack.c.bf16 %v756_v4, %v746_v12 }
 0x450   : > { %v752_v5 = vsel %vm429_vm7, %v749_v58, %v751_v0  ;;  %v765_v6 = vsel %vm440_vm13, %v761_v2, 0.0 }
 0x451   : > { %v757_v9 = vmul.f32 %v2298_v21, %v752_v5  ;;  %v767_v11 = vmul.f32 %v2316_v38, %v765_v6 }
 0x453   : > { %v759_v13 = vpop.permute.xlu1 %758  ;;  %v771_v14 = vpop.permute.xlu0 %770  ;;  %v1850_v15 = vpack.c.bf16 %v757_v9, %v747_v7  ;;  %v1854_v25 = vpack.c.bf16 %v767_v11, %v717_v44 }
 0x454   : > { %v762_v19 = vsel %vm440_vm13, %v759_v13, %v761_v2  ;;  %v775_v23 = vsel %vm451_vm14, %v771_v14, 0.0 }
 0x455   : > { %v766_v20 = vmul.f32 %v2322_v41, %v762_v19  ;;  %1851 = vmatprep.subr.bf16.mxu1 %v1850_v15  ;;  %v777_v29 = vmul.f32 %v2298_v21, %v775_v23 }
 0x456   : > { %1853 = vmatpush1.bf16.msra.mxu1 %v1852_v18 }
 0x457   : > { %v1856_v26 = vpack.c.bf16 %v766_v20, %v2433_v43  ;;  %v769_v27 = vpop.permute.xlu1 %768  ;;  %1855 = vmatprep.subr.bf16.mxu1 %v1854_v25  ;;  %v2032_v28 = vpop.permute.xlu0 %2031 }
 0x458   : > { %v772_v30 = vsel %vm451_vm14, %v769_v27, %v771_v14  ;;  %v2034_v31 = vunpack.i.h.bf16 %v2032_v28  ;;  %v2033_v32 = vunpack.i.l.bf16 %v2032_v28 }
 0x459   : > { %v776_v33 = vmul.f32 %v2302_v24, %v772_v30 }
 0x45a   : > { %v1858_v34 = vpack.c.bf16 %v2034_v31, %v777_v29  ;;  %v782_v36 = vsel %vm462_vm15, %v2033_v32, %v2034_v31  ;;  %1857 = vmatpush1.bf16.msra.mxu1 %v1856_v26 }
 0x45b   : > { %v1861_v37 = vpack.c.bf16 %v782_v36, %v776_v33  ;;  %v789_v39 = vpop.permute.xlu1 %788  ;;  %v787_v40 = vpop.permute.xlu0 %786 }
 0x45c   : > { %v793_v42 = vsel %vm471_vm1, %v789_v39, 0.0  ;;  %1860 = vmatprep.subr.msk.bf16.mxu1 %vm2341_vm0, %v1858_v34  ;;  %v790_v44 = vsel %vm471_vm1, %v787_v40, %v789_v39 }
 0x45d   : > { %v795_v43 = vmul.f32 %v2316_v38, %v793_v42  ;;  %v794_v45 = vmul.f32 %v2322_v41, %v790_v44 }
 0x45e   : > { %1862 = vmatpush1.bf16.msra.mxu1 %v1861_v37 }
 0x45f   : > { %812 = vmatprep.subr.mxu1 %v795_v43 }
 0x462   : > { %813 = vmatpush1.msra.mxu1 %v794_v45 }
 0x463   : > { %1778 = vmatmul.mubr.msk.f32.vlgmr.msra.gmra.mrb[2].mxu1 %vm478_vm2, %v2356_v16 }
 0x464   : > { %1191 = vmatprep.mubr.f32.mxu1 %v2150_v1 }
 0x536   : > { %v862_v46 = vpop.f32.mrb[2].mxu1 }
 0x537   : > { %v867_v47 = vmul.f32 %v862_v46, %v2361_v17  ;;  %v864_v48 = vpop.f32.mrb[3].mxu1 }
 0x538   : > { %v868_v49 = vmul.f32 %v864_v48, %v2361_v17 }
 0x539   : > { %v869_v50 = vadd.f32 %v867_v47, %v2364_v22 }
 0x53a   : > { %v870_v51 = vadd.f32 %v868_v49, %v2364_v22 }
 0x53b   : > { %v871_v52 = vmax.f32 %v869_v50, 0.0 }
 0x53c   : > { %v872_v53 = vmax.f32 %v870_v51, 0.0 }
 0x53d   : > { %v2496_v54 = vadd.f32 %v871_v52, %v2259_v8 }
 0x53e   : > { %v874_v55 = vadd.f32 %v872_v53, %v2261_v10 }
 0x53f   : > { %895 = vrot.lane.b32.xlu0 %v2496_v54, %s2153_s19  ;;  %877 = vrot.lane.b32.xlu1 %v2496_v54, %s2152_s18 }
 0x540   : > { %v2035_v56 = vpack.i.bf16 %v874_v55, %v2496_v54 }
 0x543   : > { %2036 = vrot.lane.b32.xlu1 %v2035_v56, %s2154_s20  ;;  %879 = vrot.lane.b32.xlu0 %v874_v55, %s2152_s18 }
 0x547   : > { %897 = vrot.lane.b32.xlu1 %v874_v55, %s2153_s19  ;;  %905 = vrot.lane.b32.xlu0 %v2496_v54, %s2155_s26 }
 0x54b   : > { %907 = vrot.lane.b32.xlu1 %v874_v55, %s2155_s26  ;;  %917 = vrot.lane.b32.xlu0 %v874_v55, %s2156_s28 }
 0x54f   : > { %915 = vrot.lane.b32.xlu1 %v2496_v54, %s2156_s28  ;;  %927 = vrot.lane.b32.xlu0 %v874_v55, %s2157_s29 }
 0x553   : > { %925 = vrot.lane.b32.xlu1 %v2496_v54, %s2157_s29  ;;  %2041 = vrot.lane.b32.xlu0 %v2035_v56, %s2158_s9 }
 0x557   : > { %945 = vrot.lane.b32.xlu1 %v874_v55, %s2159_s10  ;;  %943 = vrot.lane.b32.xlu0 %v2496_v54, %s2159_s10 }
 0x5b1   : > { %v896_v57 = vpop.permute.xlu0 %895  ;;  %v878_v58 = vpop.permute.xlu1 %877 }
 0x5b2   : > { %v884_v59 = vsel %vm398_vm3, 0.0, %v878_v58  ;;  %v902_v14 = vsel %vm418_vm12, 0.0, %v896_v57 }
 0x5b3   : > { %v885_v4 = vmul.f32 %v2302_v24, %v884_v59  ;;  %v903_v28 = vmul.f32 %v2322_v41, %v902_v14 }
 0x5b5   : > { %v2037_v60 = vpop.permute.xlu1 %2036  ;;  %v880_v61 = vpop.permute.xlu0 %879 }
 0x5b6   : > { %v2039_v62 = vunpack.i.h.bf16 %v2037_v60  ;;  %v2038_v63 = vunpack.i.l.bf16 %v2037_v60  ;;  %v881_v0 = vsel %vm398_vm3, %v878_v58, %v880_v61 }
 0x5b7   : > { %v886_v2 = vmul.f32 %v2298_v21, %v881_v0 }
 0x5b8   : > { %v891_v5 = vsel %vm409_vm5, %v2038_v63, %v2039_v62  ;;  %v1865_v11 = vpack.c.bf16 %v2038_v63, %v885_v4 }
 0x5b9   : > { %v898_v6 = vpop.permute.xlu1 %897  ;;  %v906_v7 = vpop.permute.xlu0 %905  ;;  %v1863_v9 = vpack.c.bf16 %v891_v5, %v886_v2 }
 0x5ba   : > { %v912_v12 = vsel %vm429_vm7, 0.0, %v906_v7  ;;  %v899_v13 = vsel %vm418_vm12, %v896_v57, %v898_v6 }
 0x5bb   : > { %1864 = vmatprep.subr.bf16.mxu0 %v1863_v9  ;;  %v913_v19 = vmul.f32 %v2302_v24, %v912_v12  ;;  %v904_v25 = vmul.f32 %v2316_v38, %v899_v13 }
 0x5bc   : > { %1867 = vmatpush1.bf16.msk.msra.mxu0 %vm2310_vm10, %v1865_v11 }
 0x5bd   : > { %v908_v15 = vpop.permute.xlu1 %907  ;;  %v918_v18 = vpop.permute.xlu0 %917  ;;  %v1870_v32 = vpack.c.bf16 %v913_v19, %v903_v28 }
 0x5be   : > { %v909_v20 = vsel %vm429_vm7, %v906_v7, %v908_v15  ;;  %v922_v23 = vsel %vm440_vm13, %v918_v18, 0.0 }
 0x5bf   : > { %v914_v26 = vmul.f32 %v2298_v21, %v909_v20  ;;  %v924_v27 = vmul.f32 %v2316_v38, %v922_v23 }
 0x5c1   : > { %v916_v29 = vpop.permute.xlu1 %915  ;;  %v928_v30 = vpop.permute.xlu0 %927  ;;  %v1868_v31 = vpack.c.bf16 %v914_v26, %v904_v25  ;;  %v1872_v37 = vpack.c.bf16 %v924_v27, %v874_v55 }
 0x5c2   : > { %v919_v33 = vsel %vm440_vm13, %v916_v29, %v918_v18  ;;  %v932_v36 = vsel %vm451_vm14, %v928_v30, 0.0 }
 0x5c3   : > { %v923_v34 = vmul.f32 %v2322_v41, %v919_v33  ;;  %1869 = vmatprep.subr.bf16.mxu0 %v1868_v31  ;;  %v934_v43 = vmul.f32 %v2298_v21, %v932_v36 }
 0x5c4   : > { %1871 = vmatpush1.bf16.msra.mxu0 %v1870_v32 }
 0x5c5   : > { %v1874_v39 = vpack.c.bf16 %v923_v34, %v2496_v54  ;;  %v926_v40 = vpop.permute.xlu1 %925  ;;  %1873 = vmatprep.subr.bf16.mxu0 %v1872_v37  ;;  %v2042_v42 = vpop.permute.xlu0 %2041 }
 0x5c6   : > { %v929_v44 = vsel %vm451_vm14, %v926_v40, %v928_v30  ;;  %v2044_v45 = vunpack.i.h.bf16 %v2042_v42  ;;  %v2043_v46 = vunpack.i.l.bf16 %v2042_v42 }
 0x5c7   : > { %v933_v47 = vmul.f32 %v2302_v24, %v929_v44 }
 0x5c8   : > { %v1876_v48 = vpack.c.bf16 %v2044_v45, %v934_v43  ;;  %v939_v49 = vsel %vm462_vm15, %v2043_v46, %v2044_v45  ;;  %1875 = vmatpush1.bf16.msra.mxu0 %v1874_v39 }
 0x5c9   : > { %v1879_v50 = vpack.c.bf16 %v939_v49, %v933_v47  ;;  %v946_v51 = vpop.permute.xlu1 %945  ;;  %v944_v52 = vpop.permute.xlu0 %943 }
 0x5ca   : > { %v950_v53 = vsel %vm471_vm1, %v946_v51, 0.0  ;;  %1878 = vmatprep.subr.msk.bf16.mxu0 %vm2341_vm0, %v1876_v48  ;;  %v947_v55 = vsel %vm471_vm1, %v944_v52, %v946_v51 }
 0x5cb   : > { %v952_v54 = vmul.f32 %v2316_v38, %v950_v53  ;;  %v951_v56 = vmul.f32 %v2322_v41, %v947_v55 }
 0x5cc   : > { %1880 = vmatpush1.bf16.msra.mxu0 %v1879_v50 }
 0x5cd   : > { %969 = vmatprep.subr.mxu0 %v952_v54 }
 0x5d0   : > { %970 = vmatpush1.msra.mxu0 %v951_v56 }
 0x5d1   : > { %1782 = vmatmul.mubr.msk.f32.vlgmr.msra.gmra.mrb[4].mxu0 %vm478_vm2, %v2356_v16 }
 0x5d2   : > { %1348 = vmatprep.mubr.f32.mxu0 %v2150_v1 }
 0x6a4   : > { %v1019_v57 = vpop.f32.mrb[4].mxu0 }
 0x6a5   : > { %v1024_v58 = vmul.f32 %v1019_v57, %v2361_v17  ;;  %v1021_v59 = vpop.f32.mrb[5].mxu0 }
 0x6a6   : > { %v1025_v60 = vmul.f32 %v1021_v59, %v2361_v17  ;;  %v1784_v17 = vld [vmem:[%s2884_s4 + $0x8] sm:$0xff] }
 0x6a7   : > { %v1026_v61 = vadd.f32 %v1024_v58, %v2364_v22 }
 0x6a8   : > { %v1027_v62 = vadd.f32 %v1025_v60, %v2364_v22  ;;  %v1785_v22 = vld [vmem:[%s2885_s5 + $0x8] sm:$0xff] }
 0x6a9   : > { %v2558_v63 = vmax.f32 %v1026_v61, 0.0 }
 0x6aa   : > { %v2560_v0 = vmax.f32 %v1027_v62, 0.0 }
 0x6ab   : > { %1066 = vrot.lane.b32.xlu0 %v2558_v63, %s2153_s19  ;;  %1048 = vrot.lane.b32.xlu1 %v2558_v63, %s2152_s18 }
 0x6ac   : > { %v2045_v16 = vpack.i.bf16 %v2560_v0, %v2558_v63 }
 0x6af   : > { %2046 = vrot.lane.b32.xlu1 %v2045_v16, %s2154_s20  ;;  %1050 = vrot.lane.b32.xlu0 %v2560_v0, %s2152_s18 }
 0x6b3   : > { %1068 = vrot.lane.b32.xlu1 %v2560_v0, %s2153_s19  ;;  %1076 = vrot.lane.b32.xlu0 %v2558_v63, %s2155_s26 }
 0x6b7   : > { %1078 = vrot.lane.b32.xlu1 %v2560_v0, %s2155_s26  ;;  %1088 = vrot.lane.b32.xlu0 %v2560_v0, %s2156_s28 }
 0x6bb   : > { %1086 = vrot.lane.b32.xlu1 %v2558_v63, %s2156_s28  ;;  %1098 = vrot.lane.b32.xlu0 %v2560_v0, %s2157_s29 }
 0x6bf   : > { %1096 = vrot.lane.b32.xlu1 %v2558_v63, %s2157_s29  ;;  %2051 = vrot.lane.b32.xlu0 %v2045_v16, %s2158_s9 }
 0x6c3   : > { %1116 = vrot.lane.b32.xlu1 %v2560_v0, %s2159_s10  ;;  %1114 = vrot.lane.b32.xlu0 %v2558_v63, %s2159_s10 }
 0x6c7   : > { %1036 = vperm.xlu1 %2014, %v1784_v17   ;;  %1043 = vperm.xlu0 %2003, %v1785_v22   ;;  %v2631_v22 = vld [vmem:[%s2883_s3 + $0x8] sm:$0xff] }
 0x71d   : > { %v1067_v2 = vpop.permute.xlu0 %1066  ;;  %v1049_v4 = vpop.permute.xlu1 %1048 }
 0x71e   : > { %v1055_v5 = vsel %vm398_vm3, 0.0, %v1049_v4  ;;  %v1073_v27 = vsel %vm418_vm12, 0.0, %v1067_v2 }
 0x71f   : > { %v1056_v14 = vmul.f32 %v2302_v24, %v1055_v5  ;;  %v1074_v37 = vmul.f32 %v2322_v41, %v1073_v27 }
 0x721   : > { %v2047_v6 = vpop.permute.xlu1 %2046  ;;  %v1051_v7 = vpop.permute.xlu0 %1050 }
 0x722   : > { %v2049_v9 = vunpack.i.h.bf16 %v2047_v6  ;;  %v2048_v11 = vunpack.i.l.bf16 %v2047_v6  ;;  %v1052_v12 = vsel %vm398_vm3, %v1049_v4, %v1051_v7 }
 0x723   : > { %v1057_v13 = vmul.f32 %v2298_v21, %v1052_v12 }
 0x724   : > { %v1062_v15 = vsel %vm409_vm5, %v2048_v11, %v2049_v9  ;;  %v1883_v23 = vpack.c.bf16 %v2048_v11, %v1056_v14 }
 0x725   : > { %v1069_v18 = vpop.permute.xlu1 %1068  ;;  %v1077_v19 = vpop.permute.xlu0 %1076  ;;  %v1881_v20 = vpack.c.bf16 %v1062_v15, %v1057_v13 }
 0x726   : > { %v1083_v25 = vsel %vm429_vm7, 0.0, %v1077_v19  ;;  %v1070_v26 = vsel %vm418_vm12, %v1067_v2, %v1069_v18 }
 0x727   : > { %1882 = vmatprep.subr.bf16.mxu1 %v1881_v20  ;;  %v1084_v30 = vmul.f32 %v2302_v24, %v1083_v25  ;;  %v1075_v33 = vmul.f32 %v2316_v38, %v1070_v26 }
 0x728   : > { %1885 = vmatpush1.bf16.msk.msra.mxu1 %vm2310_vm10, %v1883_v23 }
 0x729   : > { %v1079_v28 = vpop.permute.xlu1 %1078  ;;  %v1089_v29 = vpop.permute.xlu0 %1088  ;;  %v1888_v43 = vpack.c.bf16 %v1084_v30, %v1074_v37 }
 0x72a   : > { %v1080_v31 = vsel %vm429_vm7, %v1077_v19, %v1079_v28  ;;  %v1093_v32 = vsel %vm440_vm13, %v1089_v29, 0.0 }
 0x72b   : > { %v1085_v34 = vmul.f32 %v2298_v21, %v1080_v31  ;;  %v1095_v36 = vmul.f32 %v2316_v38, %v1093_v32 }
 0x72d   : > { %v1087_v39 = vpop.permute.xlu1 %1086  ;;  %v1099_v40 = vpop.permute.xlu0 %1098  ;;  %v1886_v42 = vpack.c.bf16 %v1085_v34, %v1075_v33  ;;  %v1890_v47 = vpack.c.bf16 %v1095_v36, %v2560_v0 }
 0x72e   : > { %v1090_v44 = vsel %vm440_vm13, %v1087_v39, %v1089_v29  ;;  %v1103_v46 = vsel %vm451_vm14, %v1099_v40, 0.0 }
 0x72f   : > { %v1094_v45 = vmul.f32 %v2322_v41, %v1090_v44  ;;  %1887 = vmatprep.subr.bf16.mxu1 %v1886_v42  ;;  %v1105_v51 = vmul.f32 %v2298_v21, %v1103_v46 }
 0x730   : > { %1889 = vmatpush1.bf16.msra.mxu1 %v1888_v43 }
 0x731   : > { %v1892_v48 = vpack.c.bf16 %v1094_v45, %v2558_v63  ;;  %v1097_v49 = vpop.permute.xlu1 %1096  ;;  %1891 = vmatprep.subr.bf16.mxu1 %v1890_v47  ;;  %v2052_v50 = vpop.permute.xlu0 %2051 }
 0x732   : > { %v1100_v52 = vsel %vm451_vm14, %v1097_v49, %v1099_v40  ;;  %v2054_v53 = vunpack.i.h.bf16 %v2052_v50  ;;  %v2053_v54 = vunpack.i.l.bf16 %v2052_v50 }
 0x733   : > { %v1104_v55 = vmul.f32 %v2302_v24, %v1100_v52 }
 0x734   : > { %v1894_v56 = vpack.c.bf16 %v2054_v53, %v1105_v51  ;;  %v1110_v57 = vsel %vm462_vm15, %v2053_v54, %v2054_v53  ;;  %1893 = vmatpush1.bf16.msra.mxu1 %v1892_v48 }
 0x735   : > { %v1897_v58 = vpack.c.bf16 %v1110_v57, %v1104_v55  ;;  %v1117_v59 = vpop.permute.xlu1 %1116  ;;  %v1115_v60 = vpop.permute.xlu0 %1114 }
 0x736   : > { %v1121_v61 = vsel %vm471_vm1, %v1117_v59, 0.0  ;;  %1896 = vmatprep.subr.msk.bf16.mxu1 %vm2341_vm0, %v1894_v56  ;;  %v1118_v16 = vsel %vm471_vm1, %v1115_v60, %v1117_v59 }
 0x737   : > { %v1123_v62 = vmul.f32 %v2316_v38, %v1121_v61  ;;  %v1122_v17 = vmul.f32 %v2322_v41, %v1118_v16 }
 0x738   : > { %1898 = vmatpush1.bf16.msra.mxu1 %v1897_v58 }
 0x739   : > { %1143 = vmatprep.subr.mxu1 %v1123_v62 }
 0x73c   : > { %1144 = vmatpush1.msra.mxu1 %v1122_v17 }
 0x73d   : > { %1789 = vmatmul.mubr.msk.f32.vlgmr.msra.gmra.mrb[4].mxu1 %vm478_vm2, %v2631_v22 }
 0x73e   : > { %1505 = vmatprep.mubr.f32.mxu1 %v2150_v1 }
 0x746   : > { %v2636_v2 = vpop.permute.xlu1 %1036  ;;  %v2639_v7 = vpop.permute.xlu0 %1043 }
 0x810   : > { %v1193_v4 = vpop.f32.mrb[4].mxu1 }
 0x811   : > { %v1198_v5 = vmul.f32 %v1193_v4, %v2636_v2  ;;  %v1195_v6 = vpop.f32.mrb[5].mxu1 }
 0x812   : > { %v1199_v9 = vmul.f32 %v1195_v6, %v2636_v2 }
 0x813   : > { %v1200_v11 = vadd.f32 %v1198_v5, %v2639_v7 }
 0x814   : > { %v1201_v12 = vadd.f32 %v1199_v9, %v2639_v7 }
 0x815   : > { %v1202_v13 = vmax.f32 %v1200_v11, 0.0 }
 0x816   : > { %v1203_v14 = vmax.f32 %v1201_v12, 0.0 }
 0x817   : > { %v2645_v15 = vadd.f32 %v1202_v13, %v2558_v63 }
 0x818   : > { %v1205_v18 = vadd.f32 %v1203_v14, %v2560_v0 }
 0x819   : > { %1226 = vrot.lane.b32.xlu0 %v2645_v15, %s2153_s19  ;;  %1208 = vrot.lane.b32.xlu1 %v2645_v15, %s2152_s18 }
 0x81a   : > { %v2055_v19 = vpack.i.bf16 %v1205_v18, %v2645_v15 }
 0x81d   : > { %2056 = vrot.lane.b32.xlu1 %v2055_v19, %s2154_s20  ;;  %1210 = vrot.lane.b32.xlu0 %v1205_v18, %s2152_s18 }
 0x821   : > { %1228 = vrot.lane.b32.xlu1 %v1205_v18, %s2153_s19  ;;  %1236 = vrot.lane.b32.xlu0 %v2645_v15, %s2155_s26 }
 0x825   : > { %1238 = vrot.lane.b32.xlu1 %v1205_v18, %s2155_s26  ;;  %1248 = vrot.lane.b32.xlu0 %v1205_v18, %s2156_s28 }
 0x829   : > { %1246 = vrot.lane.b32.xlu1 %v2645_v15, %s2156_s28  ;;  %1258 = vrot.lane.b32.xlu0 %v1205_v18, %s2157_s29 }
 0x82d   : > { %1256 = vrot.lane.b32.xlu1 %v2645_v15, %s2157_s29  ;;  %2061 = vrot.lane.b32.xlu0 %v2055_v19, %s2158_s9 }
 0x831   : > { %1276 = vrot.lane.b32.xlu1 %v1205_v18, %s2159_s10  ;;  %1274 = vrot.lane.b32.xlu0 %v2645_v15, %s2159_s10 }
 0x88b   : > { %v1227_v20 = vpop.permute.xlu0 %1226  ;;  %v1209_v23 = vpop.permute.xlu1 %1208 }
 0x88c   : > { %v1215_v25 = vsel %vm398_vm3, 0.0, %v1209_v23  ;;  %v1233_v43 = vsel %vm418_vm12, 0.0, %v1227_v20 }
 0x88d   : > { %v1216_v32 = vmul.f32 %v2302_v24, %v1215_v25  ;;  %v1234_v52 = vmul.f32 %v2322_v41, %v1233_v43 }
 0x88f   : > { %v2057_v26 = vpop.permute.xlu1 %2056  ;;  %v1211_v27 = vpop.permute.xlu0 %1210 }
 0x890   : > { %v2059_v28 = vunpack.i.h.bf16 %v2057_v26  ;;  %v2058_v29 = vunpack.i.l.bf16 %v2057_v26  ;;  %v1212_v30 = vsel %vm398_vm3, %v1209_v23, %v1211_v27 }
 0x891   : > { %v1217_v31 = vmul.f32 %v2298_v21, %v1212_v30 }
 0x892   : > { %v1222_v33 = vsel %vm409_vm5, %v2058_v29, %v2059_v28  ;;  %v1901_v39 = vpack.c.bf16 %v2058_v29, %v1216_v32 }
 0x893   : > { %v1229_v34 = vpop.permute.xlu1 %1228  ;;  %v1237_v36 = vpop.permute.xlu0 %1236  ;;  %v1899_v37 = vpack.c.bf16 %v1222_v33, %v1217_v31 }
 0x894   : > { %v1243_v40 = vsel %vm429_vm7, 0.0, %v1237_v36  ;;  %v1230_v42 = vsel %vm418_vm12, %v1227_v20, %v1229_v34 }
 0x895   : > { %1900 = vmatprep.subr.bf16.mxu0 %v1899_v37  ;;  %v1244_v46 = vmul.f32 %v2302_v24, %v1243_v40  ;;  %v1235_v49 = vmul.f32 %v2316_v38, %v1230_v42 }
 0x896   : > { %1903 = vmatpush1.bf16.msk.msra.mxu0 %vm2310_vm10, %v1901_v39 }
 0x897   : > { %v1239_v44 = vpop.permute.xlu1 %1238  ;;  %v1249_v45 = vpop.permute.xlu0 %1248  ;;  %v1906_v56 = vpack.c.bf16 %v1244_v46, %v1234_v52 }
 0x898   : > { %v1240_v47 = vsel %vm429_vm7, %v1237_v36, %v1239_v44  ;;  %v1253_v48 = vsel %vm440_vm13, %v1249_v45, 0.0 }
 0x899   : > { %v1245_v50 = vmul.f32 %v2298_v21, %v1240_v47  ;;  %v1255_v51 = vmul.f32 %v2316_v38, %v1253_v48 }
 0x89b   : > { %v1247_v53 = vpop.permute.xlu1 %1246  ;;  %v1259_v54 = vpop.permute.xlu0 %1258  ;;  %v1904_v55 = vpack.c.bf16 %v1245_v50, %v1235_v49  ;;  %v1908_v60 = vpack.c.bf16 %v1255_v51, %v1205_v18 }
 0x89c   : > { %v1250_v57 = vsel %vm440_vm13, %v1247_v53, %v1249_v45  ;;  %v1263_v59 = vsel %vm451_vm14, %v1259_v54, 0.0 }
 0x89d   : > { %v1254_v58 = vmul.f32 %v2322_v41, %v1250_v57  ;;  %1905 = vmatprep.subr.bf16.mxu0 %v1904_v55  ;;  %v1265_v17 = vmul.f32 %v2298_v21, %v1263_v59 }
 0x89e   : > { %1907 = vmatpush1.bf16.msra.mxu0 %v1906_v56 }
 0x89f   : > { %v1910_v61 = vpack.c.bf16 %v1254_v58, %v2645_v15  ;;  %v1257_v62 = vpop.permute.xlu1 %1256  ;;  %1909 = vmatprep.subr.bf16.mxu0 %v1908_v60  ;;  %v2062_v16 = vpop.permute.xlu0 %2061 }
 0x8a0   : > { %v1260_v4 = vsel %vm451_vm14, %v1257_v62, %v1259_v54  ;;  %v2064_v5 = vunpack.i.h.bf16 %v2062_v16  ;;  %v2063_v6 = vunpack.i.l.bf16 %v2062_v16 }
 0x8a1   : > { %v1264_v9 = vmul.f32 %v2302_v24, %v1260_v4 }
 0x8a2   : > { %v1912_v11 = vpack.c.bf16 %v2064_v5, %v1265_v17  ;;  %v1270_v12 = vsel %vm462_vm15, %v2063_v6, %v2064_v5  ;;  %1911 = vmatpush1.bf16.msra.mxu0 %v1910_v61 }
 0x8a3   : > { %v1915_v13 = vpack.c.bf16 %v1270_v12, %v1264_v9  ;;  %v1277_v14 = vpop.permute.xlu1 %1276  ;;  %v1275_v18 = vpop.permute.xlu0 %1274 }
 0x8a4   : > { %v1281_v15 = vsel %vm471_vm1, %v1277_v14, 0.0  ;;  %1914 = vmatprep.subr.msk.bf16.mxu0 %vm2341_vm0, %v1912_v11  ;;  %v1278_v20 = vsel %vm471_vm1, %v1275_v18, %v1277_v14 }
 0x8a5   : > { %v1283_v19 = vmul.f32 %v2316_v38, %v1281_v15  ;;  %v1282_v23 = vmul.f32 %v2322_v41, %v1278_v20 }
 0x8a6   : > { %1916 = vmatpush1.bf16.msra.mxu0 %v1915_v13 }
 0x8a7   : > { %1300 = vmatprep.subr.mxu0 %v1283_v19 }
 0x8aa   : > { %1301 = vmatpush1.msra.mxu0 %v1282_v23 }
 0x8ab   : > { %1793 = vmatmul.mubr.msk.f32.vlgmr.msra.gmra.mrb[6].mxu0 %vm478_vm2, %v2631_v22 }
 0x8ac   : > { %1662 = vmatprep.mubr.f32.mxu0 %v2150_v1 }
 0x97e   : > { %v1350_v25 = vpop.f32.mrb[6].mxu0 }
 0x97f   : > { %v1355_v26 = vmul.f32 %v1350_v25, %v2636_v2  ;;  %v1352_v27 = vpop.f32.mrb[7].mxu0 }
 0x980   : > { %v1356_v28 = vmul.f32 %v1352_v27, %v2636_v2 }
 0x981   : > { %v1357_v29 = vadd.f32 %v1355_v26, %v2639_v7 }
 0x982   : > { %v1358_v30 = vadd.f32 %v1356_v28, %v2639_v7 }
 0x983   : > { %v1359_v31 = vmax.f32 %v1357_v29, 0.0 }
 0x984   : > { %v1360_v32 = vmax.f32 %v1358_v30, 0.0 }
 0x985   : > { %v2708_v33 = vadd.f32 %v1359_v31, %v2558_v63 }
 0x986   : > { %v1362_v34 = vadd.f32 %v1360_v32, %v2560_v0 }
 0x987   : > { %1383 = vrot.lane.b32.xlu0 %v2708_v33, %s2153_s19  ;;  %1365 = vrot.lane.b32.xlu1 %v2708_v33, %s2152_s18 }
 0x988   : > { %v2065_v1 = vpack.i.bf16 %v1362_v34, %v2708_v33 }
 0x98b   : > { %2066 = vrot.lane.b32.xlu1 %v2065_v1, %s2154_s20  ;;  %1367 = vrot.lane.b32.xlu0 %v1362_v34, %s2152_s18 }
 0x98f   : > { %1385 = vrot.lane.b32.xlu1 %v1362_v34, %s2153_s19  ;;  %1393 = vrot.lane.b32.xlu0 %v2708_v33, %s2155_s26 }
 0x993   : > { %1395 = vrot.lane.b32.xlu1 %v1362_v34, %s2155_s26  ;;  %1405 = vrot.lane.b32.xlu0 %v1362_v34, %s2156_s28 }
 0x997   : > { %1403 = vrot.lane.b32.xlu1 %v2708_v33, %s2156_s28  ;;  %1415 = vrot.lane.b32.xlu0 %v1362_v34, %s2157_s29 }
 0x99b   : > { %1413 = vrot.lane.b32.xlu1 %v2708_v33, %s2157_s29  ;;  %2071 = vrot.lane.b32.xlu0 %v2065_v1, %s2158_s9 }
 0x99f   : > { %1433 = vrot.lane.b32.xlu1 %v1362_v34, %s2159_s10  ;;  %1431 = vrot.lane.b32.xlu0 %v2708_v33, %s2159_s10 }
 0x9f9   : > { %v1384_v36 = vpop.permute.xlu0 %1383  ;;  %v1366_v37 = vpop.permute.xlu1 %1365 }
 0x9fa   : > { %v1372_v39 = vsel %vm398_vm3, 0.0, %v1366_v37  ;;  %v1390_v55 = vsel %vm418_vm12, 0.0, %v1384_v36 }
 0x9fb   : > { %v1373_v47 = vmul.f32 %v2302_v24, %v1372_v39  ;;  %v1391_v17 = vmul.f32 %v2322_v41, %v1390_v55 }
 0x9fd   : > { %v2067_v40 = vpop.permute.xlu1 %2066  ;;  %v1368_v42 = vpop.permute.xlu0 %1367 }
 0x9fe   : > { %v2069_v43 = vunpack.i.h.bf16 %v2067_v40  ;;  %v2068_v44 = vunpack.i.l.bf16 %v2067_v40  ;;  %v1369_v45 = vsel %vm398_vm3, %v1366_v37, %v1368_v42 }
 0x9ff   : > { %v1374_v46 = vmul.f32 %v2298_v21, %v1369_v45 }
 0xa00   : > { %v1379_v48 = vsel %vm409_vm5, %v2068_v44, %v2069_v43  ;;  %v1919_v52 = vpack.c.bf16 %v2068_v44, %v1373_v47 }
 0xa01   : > { %v1386_v49 = vpop.permute.xlu1 %1385  ;;  %v1394_v50 = vpop.permute.xlu0 %1393  ;;  %v1917_v51 = vpack.c.bf16 %v1379_v48, %v1374_v46 }
 0xa02   : > { %v1400_v53 = vsel %vm429_vm7, 0.0, %v1394_v50  ;;  %v1387_v54 = vsel %vm418_vm12, %v1384_v36, %v1386_v49 }
 0xa03   : > { %1918 = vmatprep.subr.bf16.mxu1 %v1917_v51  ;;  %v1401_v58 = vmul.f32 %v2302_v24, %v1400_v53  ;;  %v1392_v61 = vmul.f32 %v2316_v38, %v1387_v54 }
 0xa04   : > { %1921 = vmatpush1.bf16.msk.msra.mxu1 %vm2310_vm10, %v1919_v52 }
 0xa05   : > { %v1396_v56 = vpop.permute.xlu1 %1395  ;;  %v1406_v57 = vpop.permute.xlu0 %1405  ;;  %v1924_v9 = vpack.c.bf16 %v1401_v58, %v1391_v17 }
 0xa06   : > { %v1397_v59 = vsel %vm429_vm7, %v1394_v50, %v1396_v56  ;;  %v1410_v60 = vsel %vm440_vm13, %v1406_v57, 0.0 }
 0xa07   : > { %v1402_v62 = vmul.f32 %v2298_v21, %v1397_v59  ;;  %v1412_v16 = vmul.f32 %v2316_v38, %v1410_v60 }
 0xa09   : > { %v1404_v4 = vpop.permute.xlu1 %1403  ;;  %v1416_v5 = vpop.permute.xlu0 %1415  ;;  %v1922_v6 = vpack.c.bf16 %v1402_v62, %v1392_v61  ;;  %v1926_v14 = vpack.c.bf16 %v1412_v16, %v1362_v34 }
 0xa0a   : > { %v1407_v11 = vsel %vm440_vm13, %v1404_v4, %v1406_v57  ;;  %v1420_v13 = vsel %vm451_vm14, %v1416_v5, 0.0 }
 0xa0b   : > { %v1411_v12 = vmul.f32 %v2322_v41, %v1407_v11  ;;  %1923 = vmatprep.subr.bf16.mxu1 %v1922_v6  ;;  %v1422_v20 = vmul.f32 %v2298_v21, %v1420_v13 }
 0xa0c   : > { %1925 = vmatpush1.bf16.msra.mxu1 %v1924_v9 }
 0xa0d   : > { %v1928_v18 = vpack.c.bf16 %v1411_v12, %v2708_v33  ;;  %v1414_v15 = vpop.permute.xlu1 %1413  ;;  %1927 = vmatprep.subr.bf16.mxu1 %v1926_v14  ;;  %v2072_v19 = vpop.permute.xlu0 %2071 }
 0xa0e   : > { %v1417_v23 = vsel %vm451_vm14, %v1414_v15, %v1416_v5  ;;  %v2074_v25 = vunpack.i.h.bf16 %v2072_v19  ;;  %v2073_v26 = vunpack.i.l.bf16 %v2072_v19 }
 0xa0f   : > { %v1421_v27 = vmul.f32 %v2302_v24, %v1417_v23 }
 0xa10   : > { %v1930_v28 = vpack.c.bf16 %v2074_v25, %v1422_v20  ;;  %v1427_v29 = vsel %vm462_vm15, %v2073_v26, %v2074_v25  ;;  %1929 = vmatpush1.bf16.msra.mxu1 %v1928_v18 }
 0xa11   : > { %v1933_v30 = vpack.c.bf16 %v1427_v29, %v1421_v27  ;;  %v1434_v31 = vpop.permute.xlu1 %1433  ;;  %v1432_v32 = vpop.permute.xlu0 %1431 }
 0xa12   : > { %v1438_v33 = vsel %vm471_vm1, %v1434_v31, 0.0  ;;  %1932 = vmatprep.subr.msk.bf16.mxu1 %vm2341_vm0, %v1930_v28  ;;  %v1435_v1 = vsel %vm471_vm1, %v1432_v32, %v1434_v31 }
 0xa13   : > { %v1440_v34 = vmul.f32 %v2316_v38, %v1438_v33  ;;  %v1439_v36 = vmul.f32 %v2322_v41, %v1435_v1 }
 0xa14   : > { %1934 = vmatpush1.bf16.msra.mxu1 %v1933_v30 }
 0xa15   : > { %1457 = vmatprep.subr.mxu1 %v1440_v34 }
 0xa18   : > { %1458 = vmatpush1.msra.mxu1 %v1439_v36 }
 0xa19   : > { %1797 = vmatmul.mubr.msk.f32.vlgmr.msra.gmra.mrb[6].mxu1 %vm478_vm2, %v2631_v22 }
 0xaec   : > { %v1507_v37 = vpop.f32.mrb[6].mxu1 }
 0xaed   : > { %v1512_v39 = vmul.f32 %v1507_v37, %v2636_v2  ;;  %v1509_v40 = vpop.f32.mrb[7].mxu1 }
 0xaee   : > { %v1513_v42 = vmul.f32 %v1509_v40, %v2636_v2 }
 0xaef   : > { %v1514_v43 = vadd.f32 %v1512_v39, %v2639_v7 }
 0xaf0   : > { %v1515_v44 = vadd.f32 %v1513_v42, %v2639_v7 }
 0xaf1   : > { %v1516_v45 = vmax.f32 %v1514_v43, 0.0 }
 0xaf2   : > { %v1517_v46 = vmax.f32 %v1515_v44, 0.0 }
 0xaf3   : > { %v2770_v47 = vadd.f32 %v1516_v45, %v2558_v63 }
 0xaf4   : > { %v1519_v48 = vadd.f32 %v1517_v46, %v2560_v0 }
 0xaf5   : > { %1540 = vrot.lane.b32.xlu0 %v2770_v47, %s2153_s19  ;;  %1522 = vrot.lane.b32.xlu1 %v2770_v47, %s2152_s18 }
 0xaf6   : > { %v2075_v49 = vpack.i.bf16 %v1519_v48, %v2770_v47 }
 0xaf9   : > { %2076 = vrot.lane.b32.xlu1 %v2075_v49, %s2154_s20  ;;  %1524 = vrot.lane.b32.xlu0 %v1519_v48, %s2152_s18  ;;  %s242_s18 = sand.u32 1, %s2140_s22   ;;  %s1808_s20 = sshll.u32 %s2218_s25, 8 }
 0xafa   : > { %s1680_s25 = scalar_lea.sflag [#allocation3], %s242_s18 }
 0xafd   : > { %1542 = vrot.lane.b32.xlu1 %v1519_v48, %s2153_s19  ;;  %1550 = vrot.lane.b32.xlu0 %v2770_v47, %s2155_s26  ;;  %s1757_s19 = sshll.u32 %s242_s18, 4 }
 0xb01   : > { %1552 = vrot.lane.b32.xlu1 %v1519_v48, %s2155_s26  ;;  %1562 = vrot.lane.b32.xlu0 %v1519_v48, %s2156_s28  ;;  %s244_s26 = scalar_lea.vmem [#allocation2], %s1757_s19 }
 0xb05   : > { %1560 = vrot.lane.b32.xlu1 %v2770_v47, %s2156_s28  ;;  %1572 = vrot.lane.b32.xlu0 %v1519_v48, %s2157_s29  ;;  %s1694_s28 = sshll.u32 %s244_s26, 4  ;;  %s2840_s28 = int_to_ptr.vmem [resolvable:$true] %s1694_s28 }
 0xb06   : > { %s2086_s16 = scalar_lea.vmem %s2840_s28, 256  ;;  %p2093_p0 = scmp.lt.s32.totalorder %s2840_s28, %s2091_s11 }
 0xb07   : > { %p2087_p11 = scmp.ne.s32.totalorder %s2840_s28, %s2086_s16  ;;  %p2094_p1 = scmp.lt.s32.totalorder %s2092_s12, %s2086_s16 }
 0xb09   : > { %1570 = vrot.lane.b32.xlu1 %v2770_v47, %s2157_s29  ;;  %2081 = vrot.lane.b32.xlu0 %v2075_v49, %s2158_s9  ;;  %p2088_p12 = pnand %p2087_p11, %p2235_p5  ;;  %p2095_p2 = por %p2094_p1, %p2093_p0 }
 0xb0b   : > { %p2089_p13 = pneg %p2088_p12 }
 0xb0d   : > { %1590 = vrot.lane.b32.xlu1 %v1519_v48, %s2159_s10  ;;  %1588 = vrot.lane.b32.xlu0 %v2770_v47, %s2159_s10  ;;  %s2838_s10 = scalar_lea.hbm %s2886_s6, %s1808_s20  ;;  %p2096_p3 = pnand %p2095_p2, %p2089_p13 }
 0xb67   : > { %v1541_v63 = vpop.permute.xlu0 %1540  ;;  %v1523_v0 = vpop.permute.xlu1 %1522 }
 0xb68   : > { %v1529_v50 = vsel %vm398_vm3, 0.0, %v1523_v0  ;;  %v1547_v4 = vsel %vm418_vm12, 0.0, %v1541_v63 }
 0xb69   : > { %v1530_v57 = vmul.f32 %v2302_v24, %v1529_v50  ;;  %v1548_v15 = vmul.f32 %v2322_v41, %v1547_v4 }
 0xb6b   : > { %v2077_v51 = vpop.permute.xlu1 %2076  ;;  %v1525_v52 = vpop.permute.xlu0 %1524 }
 0xb6c   : > { %v2079_v53 = vunpack.i.h.bf16 %v2077_v51  ;;  %v2078_v54 = vunpack.i.l.bf16 %v2077_v51  ;;  %v1526_v55 = vsel %vm398_vm3, %v1523_v0, %v1525_v52 }
 0xb6d   : > { %v1531_v56 = vmul.f32 %v2298_v21, %v1526_v55 }
 0xb6e   : > { %v1536_v58 = vsel %vm409_vm5, %v2078_v54, %v2079_v53  ;;  %v1937_v62 = vpack.c.bf16 %v2078_v54, %v1530_v57 }
 0xb6f   : > { %v1543_v59 = vpop.permute.xlu1 %1542  ;;  %v1551_v60 = vpop.permute.xlu0 %1550  ;;  %v1935_v61 = vpack.c.bf16 %v1536_v58, %v1531_v56 }
 0xb70   : > { %v1557_v16 = vsel %vm429_vm7, 0.0, %v1551_v60  ;;  %v1544_v17 = vsel %vm418_vm12, %v1541_v63, %v1543_v59 }
 0xb71   : > { %1936 = vmatprep.subr.bf16.mxu0 %v1935_v61  ;;  %v1558_v9 = vmul.f32 %v2302_v24, %v1557_v16  ;;  %v1549_v13 = vmul.f32 %v2316_v38, %v1544_v17 }
 0xb72   : > { %1939 = vmatpush1.bf16.msk.msra.mxu0 %vm2310_vm10, %v1937_v62 }
 0xb73   : > { %v1553_v5 = vpop.permute.xlu1 %1552  ;;  %v1563_v6 = vpop.permute.xlu0 %1562  ;;  %v1942_v23 = vpack.c.bf16 %v1558_v9, %v1548_v15 }
 0xb74   : > { %v1554_v11 = vsel %vm429_vm7, %v1551_v60, %v1553_v5  ;;  %v1567_v12 = vsel %vm440_vm13, %v1563_v6, 0.0 }
 0xb75   : > { %v1559_v14 = vmul.f32 %v2298_v21, %v1554_v11  ;;  %v1569_v18 = vmul.f32 %v2316_v38, %v1567_v12 }
 0xb77   : > { %v1561_v35 = vpop.permute.xlu1 %1560  ;;  %v1573_v19 = vpop.permute.xlu0 %1572  ;;  %v1940_v20 = vpack.c.bf16 %v1559_v14, %v1549_v13  ;;  %v1944_v28 = vpack.c.bf16 %v1569_v18, %v1519_v48 }
 0xb78   : > { %v1564_v25 = vsel %vm440_vm13, %v1561_v35, %v1563_v6  ;;  %v1577_v27 = vsel %vm451_vm14, %v1573_v19, 0.0 }
 0xb79   : > { %v1568_v26 = vmul.f32 %v2322_v41, %v1564_v25  ;;  %1941 = vmatprep.subr.bf16.mxu0 %v1940_v20  ;;  %v1579_v32 = vmul.f32 %v2298_v21, %v1577_v27 }
 0xb7a   : > { %1943 = vmatpush1.bf16.msra.mxu0 %v1942_v23 }
 0xb7b   : > { %v1946_v29 = vpack.c.bf16 %v1568_v26, %v2770_v47  ;;  %v1571_v30 = vpop.permute.xlu1 %1570  ;;  %1945 = vmatprep.subr.bf16.mxu0 %v1944_v28  ;;  %v2082_v31 = vpop.permute.xlu0 %2081 }
 0xb7c   : > { %v1574_v33 = vsel %vm451_vm14, %v1571_v30, %v1573_v19  ;;  %v2084_v34 = vunpack.i.h.bf16 %v2082_v31  ;;  %v2083_v1 = vunpack.i.l.bf16 %v2082_v31 }
 0xb7d   : > { %v1578_v36 = vmul.f32 %v2302_v24, %v1574_v33 }
 0xb7e   : > { %v1948_v37 = vpack.c.bf16 %v2084_v34, %v1579_v32  ;;  %v1584_v39 = vsel %vm462_vm15, %v2083_v1, %v2084_v34  ;;  %1947 = vmatpush1.bf16.msra.mxu0 %v1946_v29 }
 0xb7f   : > { %v1951_v40 = vpack.c.bf16 %v1584_v39, %v1578_v36  ;;  %v1591_v42 = vpop.permute.xlu1 %1590  ;;  %v1589_v43 = vpop.permute.xlu0 %1588 }
 0xb80   : > { %v1595_v44 = vsel %vm471_vm1, %v1591_v42, 0.0  ;;  %1950 = vmatprep.subr.msk.bf16.mxu0 %vm2341_vm0, %v1948_v37  ;;  %v1592_v45 = vsel %vm471_vm1, %v1589_v43, %v1591_v42 }
 0xb81   : > { %v1597_v21 = vmul.f32 %v2316_v38, %v1595_v44  ;;  %v1596_v24 = vmul.f32 %v2322_v41, %v1592_v45 }
 0xb82   : > { %1952 = vmatpush1.bf16.msra.mxu0 %v1951_v40 }
 0xb83   : > { %1614 = vmatprep.subr.mxu0 %v1597_v21 }
 0xb86   : > { %1615 = vmatpush1.msra.mxu0 %v1596_v24 }
 0xb87   : > { %1801 = vmatmul.mubr.msk.f32.vlgmr.msra.gmra.mrb[8].mxu0 %vm478_vm2, %v2631_v22 }
 0xc5a   : > { %v1664_v46 = vpop.f32.mrb[8].mxu0 }
 0xc5b   : > { %v1669_v47 = vmul.f32 %v1664_v46, %v2636_v2  ;;  %v1666_v3 = vpop.f32.mrb[9].mxu0 }
 0xc5c   : > { %v1670_v48 = vmul.f32 %v1666_v3, %v2636_v2 }
 0xc5d   : > { %v1671_v38 = vadd.f32 %v1669_v47, %v2639_v7 }
 0xc5e   : > { %v1672_v49 = vadd.f32 %v1670_v48, %v2639_v7 }
 0xc5f   : > { %v1673_v63 = vmax.f32 %v1671_v38, 0.0 }
 0xc60   : > { %v1674_v41 = vmax.f32 %v1672_v49, 0.0 }
 0xc61   : > { %v1675_v22 = vadd.f32 %v1673_v63, %v2259_v8 }
 0xc62   : > { %v1676_v0 = vadd.f32 %v1674_v41, %v2261_v10 }
 0xc63   : > { %1677 = vst [vmem:[%s244_s26] sm:$0xff] %v1675_v22 }
 0xc64   : > { %1678 = vst [vmem:[%s244_s26 + $0x8] sm:$0xff] %v1676_v0 }
 0xc65   : > { %2099 = shalt.err (!%p2096_p3)
}
 0xc66   : > { %s2100_s13 = scalar_lea.hbm %s2838_s10, 256  ;;  %s2104_s18 = scalar_lea.hbm %s2886_s6, 512 }
 0xc67   : > { %p2101_p4 = scmp.ne.s32.totalorder %s2838_s10, %s2100_s13  ;;  %p2105_p9 = scmp.lt.u32.totalorder %s2838_s10, %s2886_s6 }
 0xc68   : > { %p2106_p10 = scmp.lt.u32.totalorder %s2104_s18, %s2100_s13  ;;  %p2108_p12 = scmp.lt.u32.totalorder %s2100_s13, %s2838_s10 }
 0xc69   : > { %p2102_p7 = pnand %p2101_p4, %p2235_p5 }
 0xc6a   : > { %p2107_p11 = por %p2106_p10, %p2105_p9 }
 0xc6b   : > { %p2103_p8 = pneg %p2102_p7 }
 0xc6c   : > { %p2109_p13 = por %p2108_p12, %p2107_p11 }
 0xc6e   : > { %p2110_p0 = pnand %p2109_p13, %p2103_p8 }
 0xc70   : > { %2113 = shalt.err (!%p2110_p0)
}
 0xc71   : > { %1953 = dma.vmem_to_hbm [thread:$0]  (%p2235_p5), %s2840_s28, 256, %s2838_s10, %s1680_s25  }
 0xc72 PF: > { %p1959_p1 = scmp.ge.s32.totalorder %s2148_s24, 2  ;;  %s1706_s26 = sand.u32 1, %s2136_s21  }
 0xc73   : > { %s1707_s29 = scalar_lea.sflag [#allocation3], %s1706_s26 }
 0xc74   : > { %p1956_p2 = pnand %p1959_p1, %p2239_p6 }
 0xc76   : > { %2131 = dma.done.wait (!%p1956_p2), %s1707_s29, 256  }
 0xc77   : > { %2133 = vsyncadd (!%p1956_p2), %s1707_s29, 4294967040  ;;  %p16_p3 = scmp.ge.s32.totalorder %s2222_s27, 4   ;;  %s2893_s21 = smov %s2140_s22 }
 0xc78   : > { %s2894_s22 = smov %s2144_s23  ;;  %s2895_s23 = smov %s2233_s30 }
 0xc79   : > { %s2896_s24 = smov %s2222_s27  ;;  %18 = sbr.rel (!%p16_p3) target bundleno = 3 (0x3), region = 82 }
 0xc80   :  { %1712 = vsyncpa [#allocation3], 1 }
 0xc81   :  { %1714 = vsyncpa [#allocation3 + $0x1], 1 }

</bundles_post_ra>
